<compile_context>
chip_gen: v5e
topology: v5e:2x2
jax: 0.10.0
libtpu: 0.0.40
codegen_flags: <defaults>
</compile_context>

<pallas_src>
import functools

import jax
import jax.numpy as jnp
from jax.experimental import pallas as pl
from jax.experimental.pallas import tpu as pltpu

_EPS = 1e-5
_SLOPE = 0.2
_VMEM_LIMIT = 32 * 1024 * 1024


# ----------------------------- Pallas kernels ------------------------------

def _conv_in_lrelu_kernel(p_ref, w_ref, b_ref, o_ref, *, do_instnorm):
    """Fused per-image: (W @ patches) + bias [-> InstanceNorm] -> LeakyReLU.

    p_ref: (1, K, S)    bf16 im2col patches of one image (K = Cin*KH*KW,
                        S = OH*OW, so the big spatial axis sits on lanes).
    w_ref: (Cout, K)    bf16 conv weight, natural PyTorch reshape order.
    b_ref: (Cout, 1)    f32 bias.
    o_ref: (1, Cout, S) bf16 output, channels-major so S stays the lane dim.
    """
    y = jnp.dot(w_ref[...], p_ref[0], preferred_element_type=jnp.float32)
    y = y + b_ref[...]                                    # (Cout, S) f32
    if do_instnorm:
        mean = jnp.mean(y, axis=-1, keepdims=True)
        cent = y - mean
        var = jnp.mean(cent * cent, axis=-1, keepdims=True)
        y = cent * jax.lax.rsqrt(var + _EPS)
    y = jnp.where(y > 0, y, _SLOPE * y)
    o_ref[...] = y.astype(o_ref.dtype)[None]


def _conv_head_kernel(p_ref, w4_ref, b4_ref, w5_ref, b5_ref, o_ref):
    """Layer 4 (conv + InstanceNorm + LeakyReLU) fused with the final
    Conv(8F->1, 4, 1, 0) head, all per image (layer-4 activation never
    touches HBM).

    p_ref : (1, K4, 16) bf16   patches of the 8x8 layer-3 activation.
    w4_ref: (C4, K4)    bf16
    b4_ref: (C4, 1)     f32
    w5_ref: (C4, 16)    f32    final conv weight, (channel, spatial) order.
    b5_ref: (1, 1)      f32
    o_ref : (1, 1, 128) f32    scalar logit broadcast across 128 lanes.
    """
    y = jnp.dot(w4_ref[...], p_ref[0], preferred_element_type=jnp.float32)
    y = y + b4_ref[...]                                   # (C4, 16) f32
    mean = jnp.mean(y, axis=-1, keepdims=True)
    cent = y - mean
    var = jnp.mean(cent * cent, axis=-1, keepdims=True)
    y = cent * jax.lax.rsqrt(var + _EPS)
    y = jnp.where(y > 0, y, _SLOPE * y)
    # Final 4x4 "valid" conv over the 4x4 map == full dot with w5.
    s = jnp.sum(y * w5_ref[...]) + b5_ref[0, 0]
    o_ref[...] = jnp.broadcast_to(s, o_ref.shape).astype(o_ref.dtype)


# ------------------------------ wrappers ------------------------------------

def _im2col_nchw(x_nchw, kh, kw, stride, pad):
    """Patches in NCHW layout: output (N, Cin*KH*KW, OH*OW).

    K is ordered (c, kh, kw), matching PyTorch's weight.reshape(Cout, Cin*KH*KW),
    and the stack+reshape is contiguous - no transpose of the big patch tensor.
    """
    # TODO(synk): patch extraction (pad/slice/stack) stays in plain JAX/XLA;
    # a further v6e-style optimization would stream the 16 taps inside the
    # kernel as a K-reduction grid axis instead of materializing im2col.
    if pad > 0:
        x_nchw = jnp.pad(x_nchw, ((0, 0), (0, 0), (pad, pad), (pad, pad)))
    n, c, h, w = x_nchw.shape
    oh = (h - kh) // stride + 1
    ow = (w - kw) // stride + 1
    slabs = [x_nchw[:, :, i:i + stride * oh:stride, j:j + stride * ow:stride]
             for i in range(kh) for j in range(kw)]
    p = jnp.stack(slabs, axis=2)                     # (N, C, KH*KW, OH, OW)
    return p.reshape(n, c * kh * kw, oh * ow), oh, ow


def _conv_block(x_nchw, w, b, *, stride, pad, do_instnorm):
    """Conv2d (4x4) + bias [+ InstanceNorm] + LeakyReLU as one Pallas call."""
    cout, cin, kh, kw = w.shape
    p, oh, ow = _im2col_nchw(x_nchw.astype(jnp.bfloat16), kh, kw, stride, pad)
    n, k, s = p.shape
    w2d = w.reshape(cout, k).astype(jnp.bfloat16)
    b2d = b.reshape(cout, 1).astype(jnp.float32)

    out = pl.pallas_call(
        functools.partial(_conv_in_lrelu_kernel, do_instnorm=do_instnorm),
        out_shape=jax.ShapeDtypeStruct((n, cout, s), jnp.bfloat16),
        grid=(n,),
        in_specs=[
            pl.BlockSpec((1, k, s), lambda i: (i, 0, 0)),
            pl.BlockSpec((cout, k), lambda i: (0, 0)),
            pl.BlockSpec((cout, 1), lambda i: (0, 0)),
        ],
        out_specs=pl.BlockSpec((1, cout, s), lambda i: (i, 0, 0)),
        compiler_params=pltpu.CompilerParams(
            dimension_semantics=("parallel",),
            vmem_limit_bytes=_VMEM_LIMIT),
    )(p, w2d, b2d)
    return out.reshape(n, cout, oh, ow)


def _conv_head(x_nchw, w4, b4, w5, b5):
    """Layer-4 conv + InstanceNorm + LReLU fused with the final conv."""
    c4, _, kh, kw = w4.shape
    p, oh, ow = _im2col_nchw(x_nchw.astype(jnp.bfloat16), kh, kw, 2, 1)
    n, k, s = p.shape
    assert (oh, ow) == (4, 4), "architecture requires a 64x64 input"
    w4_2d = w4.reshape(c4, k).astype(jnp.bfloat16)
    b4_2d = b4.reshape(c4, 1).astype(jnp.float32)
    w5_2d = w5.reshape(c4, kh * kw).astype(jnp.float32)   # (C4, 16)
    b5_2d = b5.reshape(1, 1).astype(jnp.float32)

    out = pl.pallas_call(
        _conv_head_kernel,
        out_shape=jax.ShapeDtypeStruct((n, 1, 128), jnp.float32),
        grid=(n,),
        in_specs=[
            pl.BlockSpec((1, k, s), lambda i: (i, 0, 0)),
            pl.BlockSpec((c4, k), lambda i: (0, 0)),
            pl.BlockSpec((c4, 1), lambda i: (0, 0)),
            pl.BlockSpec((c4, kh * kw), lambda i: (0, 0)),
            pl.BlockSpec((1, 1), lambda i: (0, 0)),
        ],
        out_specs=pl.BlockSpec((1, 1, 128), lambda i: (i, 0, 0)),
        compiler_params=pltpu.CompilerParams(
            dimension_semantics=("parallel",),
            vmem_limit_bytes=_VMEM_LIMIT),
    )(p, w4_2d, b4_2d, w5_2d, b5_2d)
    return out[:, :, 0].reshape(n, 1, 1, 1)


def init_discriminator_params(key, latent_vector_size, feature_map, num_channels):
    """Conv weights ~ N(0, 0.02) (mirrors Discriminator.init_weights);
    biases small uniform (PyTorch Conv2d default is left untouched)."""
    del latent_vector_size  # unused by the discriminator itself
    f, c = feature_map, num_channels
    shapes = [
        (f,     c,     4, 4),
        (2 * f, f,     4, 4),
        (4 * f, 2 * f, 4, 4),
        (8 * f, 4 * f, 4, 4),
        (1,     8 * f, 4, 4),
    ]
    params = []
    for i, shp in enumerate(shapes):
        kw_, kb_ = jax.random.split(jax.random.fold_in(key, i))
        w = 0.02 * jax.random.normal(kw_, shp, dtype=jnp.float32)
        bound = float(shp[1] * shp[2] * shp[3]) ** -0.5
        b = jax.random.uniform(kb_, (shp[0],), minval=-bound, maxval=bound,
                               dtype=jnp.float32)
        params.append((w, b))
    return params


def discriminator_forward(x_nchw, params):
    """Forward pass. Input NCHW (PyTorch convention), output (N, 1, 1, 1)."""
    (w1, b1), (w2, b2), (w3, b3), (w4, b4), (w5, b5) = params
    x = x_nchw.astype(jnp.float32)
    x = _conv_block(x, w1, b1, stride=2, pad=1, do_instnorm=False)   # 64 -> 32
    x = _conv_block(x, w2, b2, stride=2, pad=1, do_instnorm=True)    # 32 -> 16
    x = _conv_block(x, w3, b3, stride=2, pad=1, do_instnorm=True)    # 16 -> 8
    return _conv_head(x, w4, b4, w5, b5)                             # 8 -> 4 -> 1


# ------------------------------ reference -----------------------------------

def _reference_forward(x_nchw, params):
    """Plain-JAX reference (lax.conv) mirroring the kernel's precision choice:
    bf16 matmul inputs, fp32 accumulate/epilogue, final conv in fp32."""
    def conv(x, w, b, stride, pad, bf16=True):
        if bf16:
            x = x.astype(jnp.bfloat16)
            w = w.astype(jnp.bfloat16)
        y = jax.lax.conv_general_dilated(
            x, w, window_strides=(stride, stride),
            padding=[(pad, pad), (pad, pad)],
            dimension_numbers=("NCHW", "OIHW", "NCHW"),
            preferred_element_type=jnp.float32)
        return y + b.reshape(1, -1, 1, 1).astype(jnp.float32)

    def inorm(x):
        mean = jnp.mean(x, axis=(2, 3), keepdims=True)
        var = jnp.mean((x - mean) ** 2, axis=(2, 3), keepdims=True)
        return (x - mean) * jax.lax.rsqrt(var + _EPS)

    def lrelu(x):
        return jnp.where(x > 0, x, _SLOPE * x)

    (w1, b1), (w2, b2), (w3, b3), (w4, b4), (w5, b5) = params
    x = lrelu(conv(x_nchw, w1, b1, 2, 1)).astype(jnp.bfloat16)
    x = lrelu(inorm(conv(x, w2, b2, 2, 1))).astype(jnp.bfloat16)
    x = lrelu(inorm(conv(x, w3, b3, 2, 1))).astype(jnp.bfloat16)
    x = lrelu(inorm(conv(x, w4, b4, 2, 1)))          # stays fp32 into the head
    return conv(x, w5, b5, 1, 0, bf16=False)


# -------------------------------- main ---------------------------------------

if __name__ == "__main__":
    key = jax.random.PRNGKey(0)

    # Small DCGAN discriminator; 64x64 spatial is required by the fixed
    # stride-2 x4 + final 4x4 valid-conv topology.
    batch, num_channels, feature_map, latent = 2, 3, 8, 16
    x = jax.random.normal(jax.random.fold_in(key, 100),
                          (batch, num_channels, 64, 64), dtype=jnp.float32)
    params = init_discriminator_params(key, latent, feature_map, num_channels)

    fwd = jax.jit(discriminator_forward)
    out = jax.block_until_ready(fwd(x, params))
    ref = jax.block_until_ready(jax.jit(_reference_forward)(x, params))

    assert out.shape == (batch, 1, 1, 1), out.shape
    max_err = float(jnp.max(jnp.abs(out - ref)))
    assert jnp.allclose(out, ref, rtol=1e-2, atol=1e-2), (
        f"mismatch: max abs err {max_err}")
    print("KERNEL_OK")
</pallas_src>

<mosaic_0001>
module attributes {stable_mosaic.version = 11 : i64} {
  func.func @_conv_in_lrelu_kernel(%arg0: i32, %arg1: memref<1x48x1024xbf16, #tpu.memory_space<vmem>>, %arg2: memref<8x48xbf16, #tpu.memory_space<vmem>>, %arg3: memref<8x1xf32, #tpu.memory_space<vmem>>, %arg4: memref<1x8x1024xbf16, #tpu.memory_space<vmem>>) attributes {dimension_semantics = [#tpu.dimension_semantics<parallel>], iteration_bounds = array<i64: 2>, scalar_prefetch = 0 : i64, scratch_operands = 0 : i64, tpu.core_type = #tpu.core_type<tc>, window_params = [{transform_indices = @transform_0, window_bounds = array<i64: 1, 48, 1024>}, {pipeline_mode = #tpu.pipeline_mode<synchronous>, transform_indices = @transform_1, window_bounds = array<i64: 8, 48>}, {pipeline_mode = #tpu.pipeline_mode<synchronous>, transform_indices = @transform_2, window_bounds = array<i64: 8, 1>}, {transform_indices = @transform_3, window_bounds = array<i64: 1, 8, 1024>}]} {
    %c0 = arith.constant 0 : index
    %c0_0 = arith.constant 0 : index
    %0 = vector.load %arg2[%c0, %c0_0] : memref<8x48xbf16, #tpu.memory_space<vmem>>, vector<8x48xbf16>
    %c0_1 = arith.constant 0 : index
    %c0_2 = arith.constant 0 : index
    %c0_3 = arith.constant 0 : index
    %1 = vector.load %arg1[%c0_1, %c0_2, %c0_3] : memref<1x48x1024xbf16, #tpu.memory_space<vmem>>, vector<1x48x1024xbf16>
    %2 = vector.shape_cast %1 : vector<1x48x1024xbf16> to vector<48x1024xbf16>
    %cst = arith.constant dense<0.000000e+00> : vector<8x1024xf32>
    %3 = tpu.matmul %0, %2, %cst {dimension_numbers = #tpu.dot_dimension_numbers<[1], [0], [0], [1], [0, 0, 1, 1], [], []>} : vector<8x48xbf16>, vector<48x1024xbf16>, vector<8x1024xf32> -> vector<8x1024xf32>
    %c0_4 = arith.constant 0 : index
    %c0_5 = arith.constant 0 : index
    %4 = vector.load %arg3[%c0_4, %c0_5] : memref<8x1xf32, #tpu.memory_space<vmem>>, vector<8x1xf32>
    %5 = vector.broadcast %4 : vector<8x1xf32> to vector<8x1024xf32>
    %6 = arith.addf %3, %5 : vector<8x1024xf32>
    %cst_6 = arith.constant 0.000000e+00 : f32
    %7 = vector.broadcast %cst_6 : f32 to vector<8x1024xf32>
    %8 = arith.cmpf ogt, %6, %7 : vector<8x1024xf32>
    %cst_7 = arith.constant 2.000000e-01 : f32
    %9 = vector.broadcast %cst_7 : f32 to vector<8x1024xf32>
    %10 = arith.mulf %9, %6 : vector<8x1024xf32>
    %11 = arith.select %8, %6, %10 : vector<8x1024xi1>, vector<8x1024xf32>
    %12 = arith.truncf %11 : vector<8x1024xf32> to vector<8x1024xbf16>
    %13 = vector.shape_cast %12 : vector<8x1024xbf16> to vector<1x8x1024xbf16>
    %c0_8 = arith.constant 0 : index
    %c0_9 = arith.constant 0 : index
    %c0_10 = arith.constant 0 : index
    %14 = vector.load %arg4[%c0_8, %c0_9, %c0_10] : memref<1x8x1024xbf16, #tpu.memory_space<vmem>>, vector<1x8x1024xbf16>
    tpu.vector_store %arg4[%c0_8, %c0_9, %c0_10], %13 {strides = array<i32>} : memref<1x8x1024xbf16, #tpu.memory_space<vmem>>, vector<1x8x1024xbf16>,
    return
  }
  func.func @transform_0(%arg0: i32) -> (i32, i32, i32) {
    %c0_i32 = arith.constant 0 : i32
    %c0_i32_0 = arith.constant 0 : i32
    %c0_i32_1 = arith.constant 0 : i32
    return %arg0, %c0_i32, %c0_i32_0 : i32, i32, i32
  }
  func.func @transform_1(%arg0: i32) -> (i32, i32) {
    %c0_i32 = arith.constant 0 : i32
    %c0_i32_0 = arith.constant 0 : i32
    %c0_i32_1 = arith.constant 0 : i32
    return %c0_i32, %c0_i32_0 : i32, i32
  }
  func.func @transform_2(%arg0: i32) -> (i32, i32) {
    %c0_i32 = arith.constant 0 : i32
    %c0_i32_0 = arith.constant 0 : i32
    %c0_i32_1 = arith.constant 0 : i32
    return %c0_i32, %c0_i32_0 : i32, i32
  }
  func.func @transform_3(%arg0: i32) -> (i32, i32, i32) {
    %c0_i32 = arith.constant 0 : i32
    %c0_i32_0 = arith.constant 0 : i32
    %c0_i32_1 = arith.constant 0 : i32
    return %arg0, %c0_i32, %c0_i32_0 : i32, i32, i32
  }
}

module attributes {stable_mosaic.version = 11 : i64} {
  func.func @_conv_in_lrelu_kernel(%arg0: i32, %arg1: memref<1x128x256xbf16, #tpu.memory_space<vmem>>, %arg2: memref<16x128xbf16, #tpu.memory_space<vmem>>, %arg3: memref<16x1xf32, #tpu.memory_space<vmem>>, %arg4: memref<1x16x256xbf16, #tpu.memory_space<vmem>>) attributes {dimension_semantics = [#tpu.dimension_semantics<parallel>], iteration_bounds = array<i64: 2>, scalar_prefetch = 0 : i64, scratch_operands = 0 : i64, tpu.core_type = #tpu.core_type<tc>, window_params = [{transform_indices = @transform_0, window_bounds = array<i64: 1, 128, 256>}, {pipeline_mode = #tpu.pipeline_mode<synchronous>, transform_indices = @transform_1, window_bounds = array<i64: 16, 128>}, {pipeline_mode = #tpu.pipeline_mode<synchronous>, transform_indices = @transform_2, window_bounds = array<i64: 16, 1>}, {transform_indices = @transform_3, window_bounds = array<i64: 1, 16, 256>}]} {
    %c0 = arith.constant 0 : index
    %c0_0 = arith.constant 0 : index
    %0 = vector.load %arg2[%c0, %c0_0] : memref<16x128xbf16, #tpu.memory_space<vmem>>, vector<16x128xbf16>
    %c0_1 = arith.constant 0 : index
    %c0_2 = arith.constant 0 : index
    %c0_3 = arith.constant 0 : index
    %1 = vector.load %arg1[%c0_1, %c0_2, %c0_3] : memref<1x128x256xbf16, #tpu.memory_space<vmem>>, vector<1x128x256xbf16>
    %2 = vector.shape_cast %1 : vector<1x128x256xbf16> to vector<128x256xbf16>
    %cst = arith.constant dense<0.000000e+00> : vector<16x256xf32>
    %3 = tpu.matmul %0, %2, %cst {dimension_numbers = #tpu.dot_dimension_numbers<[1], [0], [0], [1], [0, 0, 1, 1], [], []>} : vector<16x128xbf16>, vector<128x256xbf16>, vector<16x256xf32> -> vector<16x256xf32>
    %c0_4 = arith.constant 0 : index
    %c0_5 = arith.constant 0 : index
    %4 = vector.load %arg3[%c0_4, %c0_5] : memref<16x1xf32, #tpu.memory_space<vmem>>, vector<16x1xf32>
    %5 = vector.broadcast %4 : vector<16x1xf32> to vector<16x256xf32>
    %6 = arith.addf %3, %5 : vector<16x256xf32>
    %cst_6 = arith.constant dense<0.000000e+00> : vector<16xf32>
    %7 = vector.multi_reduction <add>, %6, %cst_6 [1] : vector<16x256xf32> to vector<16xf32>
    %8 = vector.shape_cast %7 : vector<16xf32> to vector<16x1xf32>
    %cst_7 = arith.constant 2.560000e+02 : f32
    %9 = vector.broadcast %cst_7 : f32 to vector<16x1xf32>
    %10 = arith.divf %8, %9 : vector<16x1xf32>
    %11 = vector.broadcast %10 : vector<16x1xf32> to vector<16x256xf32>
    %12 = arith.subf %6, %11 : vector<16x256xf32>
    %13 = arith.mulf %12, %12 : vector<16x256xf32>
    %cst_8 = arith.constant dense<0.000000e+00> : vector<16xf32>
    %14 = vector.multi_reduction <add>, %13, %cst_8 [1] : vector<16x256xf32> to vector<16xf32>
    %15 = vector.shape_cast %14 : vector<16xf32> to vector<16x1xf32>
    %cst_9 = arith.constant 2.560000e+02 : f32
    %16 = vector.broadcast %cst_9 : f32 to vector<16x1xf32>
    %17 = arith.divf %15, %16 : vector<16x1xf32>
    %cst_10 = arith.constant 9.99999974E-6 : f32
    %18 = vector.broadcast %cst_10 : f32 to vector<16x1xf32>
    %19 = arith.addf %17, %18 : vector<16x1xf32>
    %20 = math.rsqrt %19 : vector<16x1xf32>
    %21 = vector.broadcast %20 : vector<16x1xf32> to vector<16x256xf32>
    %22 = arith.mulf %12, %21 : vector<16x256xf32>
    %cst_11 = arith.constant 0.000000e+00 : f32
    %23 = vector.broadcast %cst_11 : f32 to vector<16x256xf32>
    %24 = arith.cmpf ogt, %22, %23 : vector<16x256xf32>
    %cst_12 = arith.constant 2.000000e-01 : f32
    %25 = vector.broadcast %cst_12 : f32 to vector<16x256xf32>
    %26 = arith.mulf %25, %22 : vector<16x256xf32>
    %27 = arith.select %24, %22, %26 : vector<16x256xi1>, vector<16x256xf32>
    %28 = arith.truncf %27 : vector<16x256xf32> to vector<16x256xbf16>
    %29 = vector.shape_cast %28 : vector<16x256xbf16> to vector<1x16x256xbf16>
    %c0_13 = arith.constant 0 : index
    %c0_14 = arith.constant 0 : index
    %c0_15 = arith.constant 0 : index
    %30 = vector.load %arg4[%c0_13, %c0_14, %c0_15] : memref<1x16x256xbf16, #tpu.memory_space<vmem>>, vector<1x16x256xbf16>
    tpu.vector_store %arg4[%c0_13, %c0_14, %c0_15], %29 {strides = array<i32>} : memref<1x16x256xbf16, #tpu.memory_space<vmem>>, vector<1x16x256xbf16>,
    return
  }
  func.func @transform_0(%arg0: i32) -> (i32, i32, i32) {
    %c0_i32 = arith.constant 0 : i32
    %c0_i32_0 = arith.constant 0 : i32
    %c0_i32_1 = arith.constant 0 : i32
    return %arg0, %c0_i32, %c0_i32_0 : i32, i32, i32
  }
  func.func @transform_1(%arg0: i32) -> (i32, i32) {
    %c0_i32 = arith.constant 0 : i32
    %c0_i32_0 = arith.constant 0 : i32
    %c0_i32_1 = arith.constant 0 : i32
    return %c0_i32, %c0_i32_0 : i32, i32
  }
  func.func @transform_2(%arg0: i32) -> (i32, i32) {
    %c0_i32 = arith.constant 0 : i32
    %c0_i32_0 = arith.constant 0 : i32
    %c0_i32_1 = arith.constant 0 : i32
    return %c0_i32, %c0_i32_0 : i32, i32
  }
  func.func @transform_3(%arg0: i32) -> (i32, i32, i32) {
    %c0_i32 = arith.constant 0 : i32
    %c0_i32_0 = arith.constant 0 : i32
    %c0_i32_1 = arith.constant 0 : i32
    return %arg0, %c0_i32, %c0_i32_0 : i32, i32, i32
  }
}

module attributes {stable_mosaic.version = 11 : i64} {
  func.func @_conv_in_lrelu_kernel(%arg0: i32, %arg1: memref<1x256x64xbf16, #tpu.memory_space<vmem>>, %arg2: memref<32x256xbf16, #tpu.memory_space<vmem>>, %arg3: memref<32x1xf32, #tpu.memory_space<vmem>>, %arg4: memref<1x32x64xbf16, #tpu.memory_space<vmem>>) attributes {dimension_semantics = [#tpu.dimension_semantics<parallel>], iteration_bounds = array<i64: 2>, scalar_prefetch = 0 : i64, scratch_operands = 0 : i64, tpu.core_type = #tpu.core_type<tc>, window_params = [{transform_indices = @transform_0, window_bounds = array<i64: 1, 256, 64>}, {pipeline_mode = #tpu.pipeline_mode<synchronous>, transform_indices = @transform_1, window_bounds = array<i64: 32, 256>}, {pipeline_mode = #tpu.pipeline_mode<synchronous>, transform_indices = @transform_2, window_bounds = array<i64: 32, 1>}, {transform_indices = @transform_3, window_bounds = array<i64: 1, 32, 64>}]} {
    %c0 = arith.constant 0 : index
    %c0_0 = arith.constant 0 : index
    %0 = vector.load %arg2[%c0, %c0_0] : memref<32x256xbf16, #tpu.memory_space<vmem>>, vector<32x256xbf16>
    %c0_1 = arith.constant 0 : index
    %c0_2 = arith.constant 0 : index
    %c0_3 = arith.constant 0 : index
    %1 = vector.load %arg1[%c0_1, %c0_2, %c0_3] : memref<1x256x64xbf16, #tpu.memory_space<vmem>>, vector<1x256x64xbf16>
    %2 = vector.shape_cast %1 : vector<1x256x64xbf16> to vector<256x64xbf16>
    %cst = arith.constant dense<0.000000e+00> : vector<32x64xf32>
    %3 = tpu.matmul %0, %2, %cst {dimension_numbers = #tpu.dot_dimension_numbers<[1], [0], [0], [1], [0, 0, 1, 1], [], []>} : vector<32x256xbf16>, vector<256x64xbf16>, vector<32x64xf32> -> vector<32x64xf32>
    %c0_4 = arith.constant 0 : index
    %c0_5 = arith.constant 0 : index
    %4 = vector.load %arg3[%c0_4, %c0_5] : memref<32x1xf32, #tpu.memory_space<vmem>>, vector<32x1xf32>
    %5 = vector.broadcast %4 : vector<32x1xf32> to vector<32x64xf32>
    %6 = arith.addf %3, %5 : vector<32x64xf32>
    %cst_6 = arith.constant dense<0.000000e+00> : vector<32xf32>
    %7 = vector.multi_reduction <add>, %6, %cst_6 [1] : vector<32x64xf32> to vector<32xf32>
    %8 = vector.shape_cast %7 : vector<32xf32> to vector<32x1xf32>
    %cst_7 = arith.constant 6.400000e+01 : f32
    %9 = vector.broadcast %cst_7 : f32 to vector<32x1xf32>
    %10 = arith.divf %8, %9 : vector<32x1xf32>
    %11 = vector.broadcast %10 : vector<32x1xf32> to vector<32x64xf32>
    %12 = arith.subf %6, %11 : vector<32x64xf32>
    %13 = arith.mulf %12, %12 : vector<32x64xf32>
    %cst_8 = arith.constant dense<0.000000e+00> : vector<32xf32>
    %14 = vector.multi_reduction <add>, %13, %cst_8 [1] : vector<32x64xf32> to vector<32xf32>
    %15 = vector.shape_cast %14 : vector<32xf32> to vector<32x1xf32>
    %cst_9 = arith.constant 6.400000e+01 : f32
    %16 = vector.broadcast %cst_9 : f32 to vector<32x1xf32>
    %17 = arith.divf %15, %16 : vector<32x1xf32>
    %cst_10 = arith.constant 9.99999974E-6 : f32
    %18 = vector.broadcast %cst_10 : f32 to vector<32x1xf32>
    %19 = arith.addf %17, %18 : vector<32x1xf32>
    %20 = math.rsqrt %19 : vector<32x1xf32>
    %21 = vector.broadcast %20 : vector<32x1xf32> to vector<32x64xf32>
    %22 = arith.mulf %12, %21 : vector<32x64xf32>
    %cst_11 = arith.constant 0.000000e+00 : f32
    %23 = vector.broadcast %cst_11 : f32 to vector<32x64xf32>
    %24 = arith.cmpf ogt, %22, %23 : vector<32x64xf32>
    %cst_12 = arith.constant 2.000000e-01 : f32
    %25 = vector.broadcast %cst_12 : f32 to vector<32x64xf32>
    %26 = arith.mulf %25, %22 : vector<32x64xf32>
    %27 = arith.select %24, %22, %26 : vector<32x64xi1>, vector<32x64xf32>
    %28 = arith.truncf %27 : vector<32x64xf32> to vector<32x64xbf16>
    %29 = vector.shape_cast %28 : vector<32x64xbf16> to vector<1x32x64xbf16>
    %c0_13 = arith.constant 0 : index
    %c0_14 = arith.constant 0 : index
    %c0_15 = arith.constant 0 : index
    %30 = vector.load %arg4[%c0_13, %c0_14, %c0_15] : memref<1x32x64xbf16, #tpu.memory_space<vmem>>, vector<1x32x64xbf16>
    tpu.vector_store %arg4[%c0_13, %c0_14, %c0_15], %29 {strides = array<i32>} : memref<1x32x64xbf16, #tpu.memory_space<vmem>>, vector<1x32x64xbf16>,
    return
  }
  func.func @transform_0(%arg0: i32) -> (i32, i32, i32) {
    %c0_i32 = arith.constant 0 : i32
    %c0_i32_0 = arith.constant 0 : i32
    %c0_i32_1 = arith.constant 0 : i32
    return %arg0, %c0_i32, %c0_i32_0 : i32, i32, i32
  }
  func.func @transform_1(%arg0: i32) -> (i32, i32) {
    %c0_i32 = arith.constant 0 : i32
    %c0_i32_0 = arith.constant 0 : i32
    %c0_i32_1 = arith.constant 0 : i32
    return %c0_i32, %c0_i32_0 : i32, i32
  }
  func.func @transform_2(%arg0: i32) -> (i32, i32) {
    %c0_i32 = arith.constant 0 : i32
    %c0_i32_0 = arith.constant 0 : i32
    %c0_i32_1 = arith.constant 0 : i32
    return %c0_i32, %c0_i32_0 : i32, i32
  }
  func.func @transform_3(%arg0: i32) -> (i32, i32, i32) {
    %c0_i32 = arith.constant 0 : i32
    %c0_i32_0 = arith.constant 0 : i32
    %c0_i32_1 = arith.constant 0 : i32
    return %arg0, %c0_i32, %c0_i32_0 : i32, i32, i32
  }
}

module attributes {stable_mosaic.version = 11 : i64} {
  func.func @_conv_head_kernel(%arg0: i32, %arg1: memref<1x512x16xbf16, #tpu.memory_space<vmem>>, %arg2: memref<64x512xbf16, #tpu.memory_space<vmem>>, %arg3: memref<64x1xf32, #tpu.memory_space<vmem>>, %arg4: memref<64x16xf32, #tpu.memory_space<vmem>>, %arg5: memref<1x1xf32, #tpu.memory_space<vmem>>, %arg6: memref<1x1x128xf32, #tpu.memory_space<vmem>>) attributes {dimension_semantics = [#tpu.dimension_semantics<parallel>], iteration_bounds = array<i64: 2>, scalar_prefetch = 0 : i64, scratch_operands = 0 : i64, tpu.core_type = #tpu.core_type<tc>, window_params = [{transform_indices = @transform_0, window_bounds = array<i64: 1, 512, 16>}, {pipeline_mode = #tpu.pipeline_mode<synchronous>, transform_indices = @transform_1, window_bounds = array<i64: 64, 512>}, {pipeline_mode = #tpu.pipeline_mode<synchronous>, transform_indices = @transform_2, window_bounds = array<i64: 64, 1>}, {pipeline_mode = #tpu.pipeline_mode<synchronous>, transform_indices = @transform_3, window_bounds = array<i64: 64, 16>}, {pipeline_mode = #tpu.pipeline_mode<synchronous>, transform_indices = @transform_4, window_bounds = array<i64: 1, 1>}, {transform_indices = @transform_5, window_bounds = array<i64: 1, 1, 128>}]} {
    %c0 = arith.constant 0 : index
    %c0_0 = arith.constant 0 : index
    %0 = vector.load %arg2[%c0, %c0_0] : memref<64x512xbf16, #tpu.memory_space<vmem>>, vector<64x512xbf16>
    %c0_1 = arith.constant 0 : index
    %c0_2 = arith.constant 0 : index
    %c0_3 = arith.constant 0 : index
    %1 = vector.load %arg1[%c0_1, %c0_2, %c0_3] : memref<1x512x16xbf16, #tpu.memory_space<vmem>>, vector<1x512x16xbf16>
    %2 = vector.shape_cast %1 : vector<1x512x16xbf16> to vector<512x16xbf16>
    %cst = arith.constant dense<0.000000e+00> : vector<64x16xf32>
    %3 = tpu.matmul %0, %2, %cst {dimension_numbers = #tpu.dot_dimension_numbers<[1], [0], [0], [1], [0, 0, 1, 1], [], []>} : vector<64x512xbf16>, vector<512x16xbf16>, vector<64x16xf32> -> vector<64x16xf32>
    %c0_4 = arith.constant 0 : index
    %c0_5 = arith.constant 0 : index
    %4 = vector.load %arg3[%c0_4, %c0_5] : memref<64x1xf32, #tpu.memory_space<vmem>>, vector<64x1xf32>
    %5 = vector.broadcast %4 : vector<64x1xf32> to vector<64x16xf32>
    %6 = arith.addf %3, %5 : vector<64x16xf32>
    %cst_6 = arith.constant dense<0.000000e+00> : vector<64xf32>
    %7 = vector.multi_reduction <add>, %6, %cst_6 [1] : vector<64x16xf32> to vector<64xf32>
    %8 = vector.shape_cast %7 : vector<64xf32> to vector<64x1xf32>
    %cst_7 = arith.constant 1.600000e+01 : f32
    %9 = vector.broadcast %cst_7 : f32 to vector<64x1xf32>
    %10 = arith.divf %8, %9 : vector<64x1xf32>
    %11 = vector.broadcast %10 : vector<64x1xf32> to vector<64x16xf32>
    %12 = arith.subf %6, %11 : vector<64x16xf32>
    %13 = arith.mulf %12, %12 : vector<64x16xf32>
    %cst_8 = arith.constant dense<0.000000e+00> : vector<64xf32>
    %14 = vector.multi_reduction <add>, %13, %cst_8 [1] : vector<64x16xf32> to vector<64xf32>
    %15 = vector.shape_cast %14 : vector<64xf32> to vector<64x1xf32>
    %cst_9 = arith.constant 1.600000e+01 : f32
    %16 = vector.broadcast %cst_9 : f32 to vector<64x1xf32>
    %17 = arith.divf %15, %16 : vector<64x1xf32>
    %cst_10 = arith.constant 9.99999974E-6 : f32
    %18 = vector.broadcast %cst_10 : f32 to vector<64x1xf32>
    %19 = arith.addf %17, %18 : vector<64x1xf32>
    %20 = math.rsqrt %19 : vector<64x1xf32>
    %21 = vector.broadcast %20 : vector<64x1xf32> to vector<64x16xf32>
    %22 = arith.mulf %12, %21 : vector<64x16xf32>
    %cst_11 = arith.constant 0.000000e+00 : f32
    %23 = vector.broadcast %cst_11 : f32 to vector<64x16xf32>
    %24 = arith.cmpf ogt, %22, %23 : vector<64x16xf32>
    %cst_12 = arith.constant 2.000000e-01 : f32
    %25 = vector.broadcast %cst_12 : f32 to vector<64x16xf32>
    %26 = arith.mulf %25, %22 : vector<64x16xf32>
    %27 = arith.select %24, %22, %26 : vector<64x16xi1>, vector<64x16xf32>
    %c0_13 = arith.constant 0 : index
    %c0_14 = arith.constant 0 : index
    %28 = vector.load %arg4[%c0_13, %c0_14] : memref<64x16xf32, #tpu.memory_space<vmem>>, vector<64x16xf32>
    %29 = arith.mulf %27, %28 : vector<64x16xf32>
    %30 = vector.shape_cast %29 : vector<64x16xf32> to vector<1x64x16xf32>
    %cst_15 = arith.constant dense<0.000000e+00> : vector<1xf32>
    %31 = vector.multi_reduction <add>, %30, %cst_15 [1, 2] : vector<1x64x16xf32> to vector<1xf32>
    %32 = vector.shape_cast %31 : vector<1xf32> to vector<1x1x1xf32>
    %33 = vector.extract %32[0, 0, 0] : f32 from vector<1x1x1xf32>
    %c0_16 = arith.constant 0 : index
    %c0_17 = arith.constant 0 : index
    %34 = vector.load %arg5[%c0_16, %c0_17] : memref<1x1xf32, #tpu.memory_space<vmem>>, vector<1x1xf32>
    %35 = vector.extract %34[0, 0] : f32 from vector<1x1xf32>
    %36 = arith.addf %33, %35 : f32
    %37 = vector.broadcast %36 : f32 to vector<1x1x128xf32>
    %c0_18 = arith.constant 0 : index
    %c0_19 = arith.constant 0 : index
    %c0_20 = arith.constant 0 : index
    %38 = vector.load %arg6[%c0_18, %c0_19, %c0_20] : memref<1x1x128xf32, #tpu.memory_space<vmem>>, vector<1x1x128xf32>
    tpu.vector_store %arg6[%c0_18, %c0_19, %c0_20], %37 {strides = array<i32>} : memref<1x1x128xf32, #tpu.memory_space<vmem>>, vector<1x1x128xf32>,
    return
  }
  func.func @transform_0(%arg0: i32) -> (i32, i32, i32) {
    %c0_i32 = arith.constant 0 : i32
    %c0_i32_0 = arith.constant 0 : i32
    %c0_i32_1 = arith.constant 0 : i32
    return %arg0, %c0_i32, %c0_i32_0 : i32, i32, i32
  }
  func.func @transform_1(%arg0: i32) -> (i32, i32) {
    %c0_i32 = arith.constant 0 : i32
    %c0_i32_0 = arith.constant 0 : i32
    %c0_i32_1 = arith.constant 0 : i32
    return %c0_i32, %c0_i32_0 : i32, i32
  }
  func.func @transform_2(%arg0: i32) -> (i32, i32) {
    %c0_i32 = arith.constant 0 : i32
    %c0_i32_0 = arith.constant 0 : i32
    %c0_i32_1 = arith.constant 0 : i32
    return %c0_i32, %c0_i32_0 : i32, i32
  }
  func.func @transform_3(%arg0: i32) -> (i32, i32) {
    %c0_i32 = arith.constant 0 : i32
    %c0_i32_0 = arith.constant 0 : i32
    %c0_i32_1 = arith.constant 0 : i32
    return %c0_i32, %c0_i32_0 : i32, i32
  }
  func.func @transform_4(%arg0: i32) -> (i32, i32) {
    %c0_i32 = arith.constant 0 : i32
    %c0_i32_0 = arith.constant 0 : i32
    %c0_i32_1 = arith.constant 0 : i32
    return %c0_i32, %c0_i32_0 : i32, i32
  }
  func.func @transform_5(%arg0: i32) -> (i32, i32, i32) {
    %c0_i32 = arith.constant 0 : i32
    %c0_i32_0 = arith.constant 0 : i32
    %c0_i32_1 = arith.constant 0 : i32
    return %arg0, %c0_i32, %c0_i32_0 : i32, i32, i32
  }
}

</mosaic_0001>

<bundles_post_ra>
// kernel: discriminator_forward.4
= control target key start
LH: loop header
LB: loop body
LE: loop exit
PB: predicated region body
PF: predicated region fallthrough
CT: control target
= control target key end

     0   :  { %s697_s12 = smov 0   ;;  %s788_s0 = inlined_call_operand.vmem [shape: bf16[2,48,1024], index: 0, kind: input, shape index: {}]   ;;  %s789_s1 = inlined_call_operand.vmem [shape: bf16[8,48], index: 1, kind: input, shape index: {}]   ;;  %s790_s2 = inlined_call_operand.vmem [shape: f32[8,1], index: 2, kind: input, shape index: {}]   ;;  %s791_s3 = inlined_call_operand.vmem [shape: bf16[2,8,1024], index: 3, kind: output, shape index: {}]  }
   0x1 LB: > { %s518_s13 = sadd.s32 4294967295, %s674_s12   ;;  %p522_p0 = scmp.ge.s32.totalorder %s674_s12, 1  ;;  %s674_s12 = sphi %s697_s12, %s13_s12  }
   0x2   : > { %p137_p1 = scmp.lt.s32.totalorder %s674_s12, 3 }
   0x4   : > { %p138_p2 = pnand %p522_p0, %p137_p1 }
   0x5   : > { %p161_p3 = scmp.lt.s32.totalorder (!%p138_p2), %s518_s13, 1 }
   0x6   : > { %141 = sbr.rel (%p138_p2) target bundleno = 188 (0xbc), region = 32 }
   0xb   : > { %v197_v0 = vld [vmem:[%s790_s2] sm:$0xff]  ;;  %v676_v1 = vmov 0   ;;  %s793_s13 = smov (!%p161_p3, %s518_s13), 1  ;;  %vm323_vm0 = vcmask 392192  }
   0xc   : > { %667 = vset.pattern.permute.xlu0 %v676_v1  ;;  %s657_s16 = smul.u32 192, %s793_s13  ;;  %v172_v41 = vld [vmem:[%s789_s1] sm:$0xf]  ;;  %s632_s22 = sshll.u32 %s793_s13, 5 }
   0xd   : > { %200 = vperm.xlu0 %667, %v197_v0   ;;  %s779_s25 = scalar_lea.vmem %s791_s3, %s632_s22 }
   0xe   : > { %s714_s19 = scalar_lea.vmem %s788_s0, %s657_s16 }
   0xf   : > { %v592_v2 = vld [vmem:[%s714_s19 + $0x80] sm:$0xf]  ;;  %v649_v4 = vld [vmem:[%s714_s19 + $0x84] sm:$0xf]  ;;  %v600_v7 = vld [vmem:[%s714_s19 + $0x88] sm:$0xf] }
  0x10   : > { %v653_v3 = vld [vmem:[%s714_s19 + $0x9c] sm:$0xf0]  ;;  %v594_v6 = vld [vmem:[%s714_s19 + $0xa0] sm:$0xf0]  ;;  %v654_v8 = vld [vmem:[%s714_s19 + $0xa4] sm:$0xf0] }
  0x11   : > { %v593_v5 = vor.u32 %v653_v3, %v592_v2  ;;  %v597_v9 = vor.u32 %v649_v4, %v594_v6  ;;  %v601_v10 = vor.u32 %v654_v8, %v600_v7  ;;  %v650_v11 = vld [vmem:[%s714_s19 + $0x8c] sm:$0xf]  ;;  %v560_v13 = vld [vmem:[%s714_s19 + $0x40] sm:$0xf]  ;;  %v641_v16 = vld [vmem:[%s714_s19 + $0x44] sm:$0xf] }
  0x12   : > { %v602_v12 = vld [vmem:[%s714_s19 + $0xa8] sm:$0xf0]  ;;  %v645_v15 = vld [vmem:[%s714_s19 + $0x5c] sm:$0xf0]  ;;  %v562_v17 = vld [vmem:[%s714_s19 + $0x60] sm:$0xf0] }
  0x13   : > { %332 = vmatpush.bf16.msra.mxu0 %v593_v5  ;;  %v605_v14 = vor.u32 %v650_v11, %v602_v12  ;;  %345 = vmatpush.bf16.msra.mxu1 %v597_v9  ;;  %v561_v18 = vor.u32 %v645_v15, %v560_v13  ;;  %v565_v19 = vor.u32 %v641_v16, %v562_v17  ;;  %v568_v20 = vld [vmem:[%s714_s19 + $0x48] sm:$0xf]  ;;  %v642_v22 = vld [vmem:[%s714_s19 + $0x4c] sm:$0xf]  ;;  %v528_v25 = vld [vmem:[%s714_s19] sm:$0xf] }
  0x14   : > { %358 = vmatpush.bf16.msra.mxu2 %v601_v10  ;;  %v646_v21 = vld [vmem:[%s714_s19 + $0x64] sm:$0xf0]  ;;  %v570_v24 = vld [vmem:[%s714_s19 + $0x68] sm:$0xf0]  ;;  %v637_v26 = vld [vmem:[%s714_s19 + $0x1c] sm:$0xf0] }
  0x15   : > { %371 = vmatpush.bf16.msra.mxu3 %v605_v14  ;;  %v569_v23 = vor.u32 %v646_v21, %v568_v20  ;;  %v573_v27 = vor.u32 %v642_v22, %v570_v24  ;;  %v633_v28 = vld [vmem:[%s714_s19 + $0x4] sm:$0xf]  ;;  %v536_v30 = vld [vmem:[%s714_s19 + $0x8] sm:$0xf]  ;;  %v529_v31 = vor.u32 %v637_v26, %v528_v25  ;;  %v634_v33 = vld [vmem:[%s714_s19 + $0xc] sm:$0xf] }
  0x16   : > { %v530_v29 = vld [vmem:[%s714_s19 + $0x20] sm:$0xf0]  ;;  %v638_v32 = vld [vmem:[%s714_s19 + $0x24] sm:$0xf0]  ;;  %v538_v34 = vld [vmem:[%s714_s19 + $0x28] sm:$0xf0] }
  0x17   : > { %333 = vmatpush.bf16.msra.mxu0 %v561_v18  ;;  %346 = vmatpush.bf16.msra.mxu1 %v565_v19  ;;  %v533_v35 = vor.u32 %v633_v28, %v530_v29  ;;  %v537_v36 = vor.u32 %v638_v32, %v536_v30  ;;  %v616_v37 = vld [vmem:[%s714_s19 + $0x98] sm:$0xf]  ;;  %v652_v39 = vld [vmem:[%s714_s19 + $0x9c] sm:$0xf]  ;;  %v541_v40 = vor.u32 %v634_v33, %v538_v34  ;;  %v608_v44 = vld [vmem:[%s714_s19 + $0x90] sm:$0xf] }
  0x18   : > { %359 = vmatpush.bf16.msra.mxu2 %v569_v23  ;;  %v656_v38 = vld [vmem:[%s714_s19 + $0xb4] sm:$0xf0]  ;;  %v618_v43 = vld [vmem:[%s714_s19 + $0xb8] sm:$0xf0]  ;;  %v655_v45 = vld [vmem:[%s714_s19 + $0xac] sm:$0xf0] }
  0x19   : > { %372 = vmatpush.bf16.msra.mxu3 %v573_v27  ;;  %v617_v42 = vor.u32 %v656_v38, %v616_v37  ;;  %v621_v46 = vor.u32 %v652_v39, %v618_v43  ;;  %v651_v47 = vld [vmem:[%s714_s19 + $0x94] sm:$0xf]  ;;  %v584_v49 = vld [vmem:[%s714_s19 + $0x58] sm:$0xf]  ;;  %v644_v51 = vld [vmem:[%s714_s19 + $0x5c] sm:$0xf]  ;;  %v609_v53 = vor.u32 %v655_v45, %v608_v44 }
  0x1a   : > { %v610_v48 = vld [vmem:[%s714_s19 + $0xb0] sm:$0xf0]  ;;  %v648_v50 = vld [vmem:[%s714_s19 + $0x74] sm:$0xf0]  ;;  %v586_v52 = vld [vmem:[%s714_s19 + $0x78] sm:$0xf0] }
  0x1b   : > { %334 = vmatpush.bf16.msra.mxu0 %v529_v31  ;;  %347 = vmatpush.bf16.msra.mxu1 %v533_v35  ;;  %v613_v54 = vor.u32 %v651_v47, %v610_v48  ;;  %v585_v55 = vor.u32 %v648_v50, %v584_v49  ;;  %v576_v56 = vld [vmem:[%s714_s19 + $0x50] sm:$0xf]  ;;  %v643_v58 = vld [vmem:[%s714_s19 + $0x54] sm:$0xf]  ;;  %v589_v59 = vor.u32 %v644_v51, %v586_v52  ;;  %v552_v61 = vld [vmem:[%s714_s19 + $0x18] sm:$0xf] }
  0x1c   : > { %360 = vmatpush.bf16.msra.mxu2 %v537_v36  ;;  %v647_v57 = vld [vmem:[%s714_s19 + $0x6c] sm:$0xf0]  ;;  %v578_v60 = vld [vmem:[%s714_s19 + $0x70] sm:$0xf0]  ;;  %v640_v62 = vld [vmem:[%s714_s19 + $0x34] sm:$0xf0] }
  0x1d   : > { %373 = vmatpush.bf16.msra.mxu3 %v541_v40  ;;  %v636_v63 = vld [vmem:[%s714_s19 + $0x1c] sm:$0xf]  ;;  %v577_v1 = vor.u32 %v647_v57, %v576_v56  ;;  %v581_v2 = vor.u32 %v643_v58, %v578_v60  ;;  %v553_v3 = vor.u32 %v640_v62, %v552_v61  ;;  %v544_v4 = vld [vmem:[%s714_s19 + $0x10] sm:$0xf]  ;;  %v635_v7 = vld [vmem:[%s714_s19 + $0x14] sm:$0xf] }
  0x1e   : > { %622 = vmatmul.msk.bf16.vlgmr.msra.gmra.mxu0 %vm323_vm0, %v172_v41  ;;  %623 = vmatmul.msk.bf16.vlgmr.msra.gmra.mxu1 %vm323_vm0, %v172_v41  ;;  %v554_v0 = vld [vmem:[%s714_s19 + $0x38] sm:$0xf0]  ;;  %v639_v5 = vld [vmem:[%s714_s19 + $0x2c] sm:$0xf0]  ;;  %v546_v8 = vld [vmem:[%s714_s19 + $0x30] sm:$0xf0] }
  0x1f   : > { %624 = vmatmul.msk.bf16.vlgmr.msra.gmra.mxu2 %vm323_vm0, %v172_v41  ;;  %384 = vmatpush.bf16.msrb.mxu0 %v609_v53  ;;  %v557_v6 = vor.u32 %v636_v63, %v554_v0  ;;  %v545_v9 = vor.u32 %v639_v5, %v544_v4  ;;  %v549_v10 = vor.u32 %v635_v7, %v546_v8 }
  0x20   : > { %410 = vmatpush.bf16.msrb.mxu2 %v617_v42  ;;  %625 = vmatmul.msk.bf16.vlgmr.msra.gmra.mxu3 %vm323_vm0, %v172_v41 }
  0x21   : > { %423 = vmatpush.bf16.msrb.mxu3 %v621_v46  ;;  %397 = vmatpush.bf16.msrb.mxu1 %v613_v54 }
  0x23   : > { %385 = vmatpush.bf16.msrb.mxu0 %v577_v1 }
  0x24   : > { %411 = vmatpush.bf16.msrb.mxu2 %v585_v55 }
  0x25   : > { %424 = vmatpush.bf16.msrb.mxu3 %v589_v59  ;;  %398 = vmatpush.bf16.msrb.mxu1 %v581_v2 }
  0x27   : > { %386 = vmatpush.bf16.msrb.mxu0 %v545_v9 }
  0x28   : > { %412 = vmatpush.bf16.msrb.mxu2 %v553_v3 }
  0x29   : > { %425 = vmatpush.bf16.msrb.mxu3 %v557_v6  ;;  %399 = vmatpush.bf16.msrb.mxu1 %v549_v10 }
  0x2e   : > { %626 = vmatmul.msk.bf16.vlgmr.msrb.gmra.mxu0 %vm323_vm0, %v172_v41  ;;  %627 = vmatmul.msk.bf16.vlgmr.msrb.gmra.mxu1 %vm323_vm0, %v172_v41 }
  0x2f   : > { %628 = vmatmul.msk.bf16.vlgmr.msrb.gmra.mxu2 %vm323_vm0, %v172_v41 }
  0x30   : > { %629 = vmatmul.msk.bf16.vlgmr.msrb.gmra.mxu3 %vm323_vm0, %v172_v41 }
  0x7f   : > { %v201_v11 = vpop.permute.xlu0 %200 }
  0x9b   : > { %v336_v12 = vpop.f32.mrf.mxu0  ;;  %v349_v13 = vpop.f32.mrf.mxu1 }
  0x9c   : > { %v337_v14 = vadd.f32 %v336_v12, %v201_v11  ;;  %v350_v15 = vadd.f32 %v349_v13, %v201_v11 }
  0x9e   : > { %vm431_vm1 = vcmp.gt.f32.partialorder %v337_v14, 0.0  ;;  %v439_v16 = vmul.f32 0.2, %v337_v14  ;;  %vm432_vm2 = vcmp.gt.f32.partialorder %v350_v15, 0.0  ;;  %v440_v17 = vmul.f32 0.2, %v350_v15 }
  0xa0   : > { %v447_v18 = vsel %vm431_vm1, %v337_v14, %v439_v16  ;;  %v448_v19 = vsel %vm432_vm2, %v350_v15, %v440_v17 }
  0xa1   : > { %v455_v21 = vpack.c.bf16 %v448_v19, %v447_v18 }
  0xa2   : > { %v362_v20 = vpop.f32.mrf.mxu2 }
  0xa3   : > { %v363_v22 = vadd.f32 %v362_v20, %v201_v11  ;;  %v375_v23 = vpop.f32.mrf.mxu3  ;;  %v338_v24 = vpop.f32.mrf.mxu0  ;;  %459 = vst [vmem:[%s779_s25] sm:$0xff] %v455_v21 }
  0xa4   : > { %v376_v25 = vadd.f32 %v375_v23, %v201_v11  ;;  %v351_v26 = vpop.f32.mrf.mxu1 }
  0xa5   : > { %vm433_vm3 = vcmp.gt.f32.partialorder %v363_v22, 0.0  ;;  %v441_v27 = vmul.f32 0.2, %v363_v22 }
  0xa6   : > { %vm434_vm4 = vcmp.gt.f32.partialorder %v376_v25, 0.0  ;;  %v442_v28 = vmul.f32 0.2, %v376_v25 }
  0xa7   : > { %v449_v29 = vsel %vm433_vm3, %v363_v22, %v441_v27 }
  0xa8   : > { %v450_v30 = vsel %vm434_vm4, %v376_v25, %v442_v28 }
  0xa9   : > { %v456_v31 = vpack.c.bf16 %v450_v30, %v449_v29 }
  0xaa   : > { %v364_v32 = vpop.f32.mrf.mxu2 }
  0xab   : > { %460 = vst [vmem:[%s779_s25 + $0x8] sm:$0xff] %v456_v31  ;;  %v377_v33 = vpop.f32.mrf.mxu3  ;;  %v388_v34 = vpop.f32.mrf.mxu0 }
  0xac   : > { %v389_v35 = vadd.f32 %v388_v34, %v201_v11  ;;  %v401_v36 = vpop.f32.mrf.mxu1 }
  0xad   : > { %v402_v37 = vadd.f32 %v401_v36, %v201_v11 }
  0xae   : > { %vm435_vm5 = vcmp.gt.f32.partialorder %v389_v35, 0.0  ;;  %v443_v38 = vmul.f32 0.2, %v389_v35 }
  0xaf   : > { %vm436_vm6 = vcmp.gt.f32.partialorder %v402_v37, 0.0  ;;  %v444_v39 = vmul.f32 0.2, %v402_v37 }
  0xb0   : > { %v451_v40 = vsel %vm435_vm5, %v389_v35, %v443_v38 }
  0xb1   : > { %v452_v41 = vsel %vm436_vm6, %v402_v37, %v444_v39 }
  0xb2   : > { %v457_v42 = vpack.c.bf16 %v452_v41, %v451_v40  ;;  %v414_v43 = vpop.f32.mrf.mxu2 }
  0xb3   : > { %v415_v44 = vadd.f32 %v414_v43, %v201_v11  ;;  %v427_v45 = vpop.f32.mrf.mxu3  ;;  %v390_v46 = vpop.f32.mrf.mxu0 }
  0xb4   : > { %461 = vst [vmem:[%s779_s25 + $0x10] sm:$0xff] %v457_v42  ;;  %v428_v47 = vadd.f32 %v427_v45, %v201_v11  ;;  %v403_v48 = vpop.f32.mrf.mxu1 }
  0xb5   : > { %vm437_vm7 = vcmp.gt.f32.partialorder %v415_v44, 0.0  ;;  %v445_v49 = vmul.f32 0.2, %v415_v44 }
  0xb6   : > { %vm438_vm8 = vcmp.gt.f32.partialorder %v428_v47, 0.0  ;;  %v446_v50 = vmul.f32 0.2, %v428_v47 }
  0xb7   : > { %v453_v51 = vsel %vm437_vm7, %v415_v44, %v445_v49 }
  0xb8   : > { %v454_v52 = vsel %vm438_vm8, %v428_v47, %v446_v50 }
  0xb9   : > { %v458_v53 = vpack.c.bf16 %v454_v52, %v453_v51 }
  0xba   : > { %v416_v54 = vpop.f32.mrf.mxu2 }
  0xbb   : > { %462 = vst [vmem:[%s779_s25 + $0x18] sm:$0xff] %v458_v53  ;;  %v429_v55 = vpop.f32.mrf.mxu3 }
  0xbc PF: > { %s13_s12 = sadd.s32 1, %s674_s12  }
  0xbd   : > { %p10_p4 = scmp.ge.s32.totalorder %s13_s12, 4  }
  0xbf   :  { %12 = sbr.rel (!%p10_p4) target bundleno = 1 (0x1), region = 62 }

// kernel: discriminator_forward.5
= control target key start
LH: loop header
LB: loop body
LE: loop exit
PB: predicated region body
PF: predicated region fallthrough
CT: control target
= control target key end

     0   :  { %s588_s12 = smov 0   ;;  %s652_s0 = inlined_call_operand.vmem [shape: bf16[2,128,256], index: 0, kind: input, shape index: {}]   ;;  %s653_s1 = inlined_call_operand.vmem [shape: bf16[16,128], index: 1, kind: input, shape index: {}]   ;;  %s654_s2 = inlined_call_operand.vmem [shape: f32[16,1], index: 2, kind: input, shape index: {}]   ;;  %s655_s3 = inlined_call_operand.vmem [shape: bf16[2,16,256], index: 3, kind: output, shape index: {}]  }
   0x1 LB: > { %s443_s13 = sadd.s32 4294967295, %s564_s12   ;;  %p447_p0 = scmp.ge.s32.totalorder %s564_s12, 1  ;;  %s564_s12 = sphi %s588_s12, %s13_s12  }
   0x2   : > { %p137_p1 = scmp.lt.s32.totalorder %s564_s12, 3 }
   0x4   : > { %p138_p2 = pnand %p447_p0, %p137_p1 }
   0x5   : > { %p161_p3 = scmp.lt.s32.totalorder (!%p138_p2), %s443_s13, 1 }
   0x6   : > { %141 = sbr.rel (%p138_p2) target bundleno = 457 (0x1c9), region = 32 }
   0xb   : > { %s657_s13 = smov (!%p161_p3, %s443_s13), 1  ;;  %v566_v23 = vmov 0   ;;  %v189_v24 = vld [vmem:[%s654_s2] sm:$0xff]  ;;  %v190_v36 = vld [vmem:[%s654_s2 + $0x8] sm:$0xff] }
   0xc   : > { %s522_s14 = sshll.u32 %s657_s13, 7  ;;  %551 = vset.pattern.permute.xlu0 %v566_v23  ;;  %v524_v51 = vld [vmem:[%s653_s1] sm:$0xff]  ;;  %s523_s24 = sshll.u32 %s657_s13, 4 }
   0xd   : > { %s602_s17 = scalar_lea.vmem %s652_s0, %s522_s14  ;;  %193 = vperm.xlu0 %551, %v189_v24   ;;  %s170_s27 = scalar_lea.vmem %s655_s3, %s523_s24 }
   0xe   : > { %v514_v0 = vld [vmem:[%s602_s17 + $0x70] sm:$0xf]  ;;  %v540_v1 = vld [vmem:[%s602_s17 + $0x74] sm:$0xf0]  ;;  %v539_v2 = vld [vmem:[%s602_s17 + $0x74] sm:$0xf] }
   0xf   : > { %v515_v3 = vor.u32 %v540_v1, %v514_v0  ;;  %v516_v4 = vld [vmem:[%s602_s17 + $0x78] sm:$0xf0]  ;;  %v506_v5 = vld [vmem:[%s602_s17 + $0x60] sm:$0xf]  ;;  %v538_v6 = vld [vmem:[%s602_s17 + $0x64] sm:$0xf0] }
  0x10   : > { %v519_v7 = vor.u32 %v539_v2, %v516_v4  ;;  %v537_v8 = vld [vmem:[%s602_s17 + $0x64] sm:$0xf]  ;;  %v508_v9 = vld [vmem:[%s602_s17 + $0x68] sm:$0xf0]  ;;  %v507_v10 = vor.u32 %v538_v6, %v506_v5  ;;  %v498_v12 = vld [vmem:[%s602_s17 + $0x50] sm:$0xf] }
  0x11   : > { %287 = vmatpush.bf16.msra.mxu0 %v515_v3  ;;  %v511_v11 = vor.u32 %v537_v8, %v508_v9  ;;  %v536_v13 = vld [vmem:[%s602_s17 + $0x54] sm:$0xf0]  ;;  %v535_v14 = vld [vmem:[%s602_s17 + $0x54] sm:$0xf]  ;;  %v500_v15 = vld [vmem:[%s602_s17 + $0x58] sm:$0xf0] }
  0x12   : > { %301 = vmatpush.bf16.msra.mxu1 %v519_v7  ;;  %v499_v16 = vor.u32 %v536_v13, %v498_v12  ;;  %v503_v17 = vor.u32 %v535_v14, %v500_v15  ;;  %v490_v18 = vld [vmem:[%s602_s17 + $0x40] sm:$0xf]  ;;  %v534_v19 = vld [vmem:[%s602_s17 + $0x44] sm:$0xf0]  ;;  %v533_v20 = vld [vmem:[%s602_s17 + $0x44] sm:$0xf] }
  0x13   : > { %v492_v21 = vld [vmem:[%s602_s17 + $0x48] sm:$0xf0]  ;;  %v491_v22 = vor.u32 %v534_v19, %v490_v18  ;;  %v482_v26 = vld [vmem:[%s602_s17 + $0x30] sm:$0xf]  ;;  %v532_v27 = vld [vmem:[%s602_s17 + $0x34] sm:$0xf0] }
  0x14   : > { %v495_v25 = vor.u32 %v533_v20, %v492_v21  ;;  %v531_v28 = vld [vmem:[%s602_s17 + $0x34] sm:$0xf]  ;;  %v484_v29 = vld [vmem:[%s602_s17 + $0x38] sm:$0xf0]  ;;  %v483_v30 = vor.u32 %v532_v27, %v482_v26  ;;  %v474_v32 = vld [vmem:[%s602_s17 + $0x20] sm:$0xf] }
  0x15   : > { %288 = vmatpush.bf16.msra.mxu0 %v507_v10  ;;  %v487_v31 = vor.u32 %v531_v28, %v484_v29  ;;  %v530_v33 = vld [vmem:[%s602_s17 + $0x24] sm:$0xf0]  ;;  %v529_v34 = vld [vmem:[%s602_s17 + $0x24] sm:$0xf]  ;;  %v476_v35 = vld [vmem:[%s602_s17 + $0x28] sm:$0xf0]  ;;  %198 = vperm.xlu0 %551, %v190_v36  }
  0x16   : > { %302 = vmatpush.bf16.msra.mxu1 %v511_v11  ;;  %v475_v37 = vor.u32 %v530_v33, %v474_v32  ;;  %v479_v38 = vor.u32 %v529_v34, %v476_v35  ;;  %v466_v39 = vld [vmem:[%s602_s17 + $0x10] sm:$0xf]  ;;  %v528_v40 = vld [vmem:[%s602_s17 + $0x14] sm:$0xf0]  ;;  %v527_v41 = vld [vmem:[%s602_s17 + $0x14] sm:$0xf] }
  0x17   : > { %v468_v42 = vld [vmem:[%s602_s17 + $0x18] sm:$0xf0]  ;;  %v467_v43 = vor.u32 %v528_v40, %v466_v39  ;;  %v458_v45 = vld [vmem:[%s602_s17] sm:$0xf]  ;;  %v526_v46 = vld [vmem:[%s602_s17 + $0x4] sm:$0xf0] }
  0x18   : > { %v471_v44 = vor.u32 %v527_v41, %v468_v42  ;;  %v525_v47 = vld [vmem:[%s602_s17 + $0x4] sm:$0xf]  ;;  %v460_v48 = vld [vmem:[%s602_s17 + $0x8] sm:$0xf0]  ;;  %v459_v49 = vor.u32 %v526_v46, %v458_v45  ;;  %v567_v0 = vmov 256.0  }
  0x19   : > { %289 = vmatpush.bf16.msra.mxu0 %v499_v16  ;;  %v463_v50 = vor.u32 %v525_v47, %v460_v48  ;;  %552 = vrcp.f32 %v567_v0 }
  0x1a   : > { %303 = vmatpush.bf16.msra.mxu1 %v503_v17 }
  0x1d   : > { %290 = vmatpush.bf16.msra.mxu0 %v491_v22 }
  0x1e   : > { %304 = vmatpush.bf16.msra.mxu1 %v495_v25 }
  0x1f   : > { %v553_v1 = vpop.eup %552 }
  0x20   : > { %v322_v2 = vmul.f32 256.0, %v553_v1  ;;  %vm326_vm0 = vweird.f32 %v553_v1 }
  0x21   : > { %291 = vmatpush.bf16.msra.mxu0 %v483_v30 }
  0x22   : > { %305 = vmatpush.bf16.msra.mxu1 %v487_v31  ;;  %v323_v3 = vsub.f32 1.0, %v322_v2 }
  0x24   : > { %v324_v4 = vmul.f32 %v553_v1, %v323_v3 }
  0x25   : > { %292 = vmatpush.bf16.msra.mxu0 %v475_v37 }
  0x26   : > { %306 = vmatpush.bf16.msra.mxu1 %v479_v38  ;;  %v325_v5 = vadd.f32 %v553_v1, %v324_v4 }
  0x28   : > { %v327_v6 = vsel %vm326_vm0, %v553_v1, %v325_v5 }
  0x29   : > { %293 = vmatpush.bf16.msra.mxu0 %v467_v43 }
  0x2a   : > { %307 = vmatpush.bf16.msra.mxu1 %v471_v44 }
  0x2d   : > { %294 = vmatpush.bf16.msra.mxu0 %v459_v49 }
  0x2e   : > { %308 = vmatpush.bf16.msra.mxu1 %v463_v50 }
  0x30   : > { %295 = vmatmul.bf16.vlgmr.msra.gmra.mxu0 %v524_v51 }
  0x31   : > { %309 = vmatmul.bf16.vlgmr.msra.gmra.mxu1 %v524_v51 }
  0x7f   : > { %v194_v52 = vpop.permute.xlu0 %193 }
  0x87   : > { %v199_v58 = vpop.permute.xlu0 %198 }
  0xad   : > { %v296_v53 = vpop.f32.mrf.mxu0 }
  0xae   : > { %v297_v54 = vadd.f32 %v296_v53, %v194_v52  ;;  %v310_v55 = vpop.f32.mrf.mxu1 }
  0xaf   : > { %v311_v56 = vadd.f32 %v310_v55, %v194_v52 }
  0xb1   : > { %v315_v57 = vadd.f32 %v311_v56, %v297_v54 }
  0xb3   : > { %316 = vadd.xlane.f32.xlu1 %v315_v57 }
  0xb5   : > { %v298_v59 = vpop.f32.mrf.mxu0 }
  0xb6   : > { %v299_v60 = vadd.f32 %v298_v59, %v199_v58  ;;  %v312_v61 = vpop.f32.mrf.mxu1 }
  0xb7   : > { %v313_v62 = vadd.f32 %v312_v61, %v199_v58 }
  0xb9   : > { %v318_v63 = vadd.f32 %v313_v62, %v299_v60 }
  0xbb   : > { %319 = vadd.xlane.f32.xlu1 %v318_v63 }
 0x126   : > { %v317_v7 = vpop.xlane.xlu1 %316 }
 0x127   : > { %v328_v8 = vmul.f32 %v327_v6, %v317_v7 }
 0x129   : > { %v330_v9 = vsub.f32 %v297_v54, %v328_v8  ;;  %v331_v10 = vsub.f32 %v311_v56, %v328_v8 }
 0x12b   : > { %v334_v11 = vmul.f32 %v330_v9, %v330_v9  ;;  %v335_v12 = vmul.f32 %v331_v10, %v331_v10 }
 0x12d   : > { %v338_v13 = vadd.f32 %v335_v12, %v334_v11 }
 0x12e   : > { %v320_v14 = vpop.xlane.xlu1 %319 }
 0x12f   : > { %v329_v15 = vmul.f32 %v327_v6, %v320_v14  ;;  %339 = vadd.xlane.f32.xlu2 %v338_v13 }
 0x131   : > { %v332_v16 = vsub.f32 %v299_v60, %v329_v15  ;;  %v333_v17 = vsub.f32 %v313_v62, %v329_v15 }
 0x133   : > { %v336_v18 = vmul.f32 %v332_v16, %v332_v16  ;;  %v337_v19 = vmul.f32 %v333_v17, %v333_v17 }
 0x135   : > { %v341_v20 = vadd.f32 %v337_v19, %v336_v18 }
 0x137   : > { %342 = vadd.xlane.f32.xlu2 %v341_v20 }
 0x1a2   : > { %v340_v21 = vpop.xlane.xlu2 %339 }
 0x1a3   : > { %v344_v22 = vmul.f32 %v340_v21, %v327_v6 }
 0x1a5   : > { %v346_v23 = vadd.f32 1e-05, %v344_v22 }
 0x1a7   : > { %554 = vrsqrt.f32 %v346_v23  ;;  %vm354_vm2 = vweird.f32 %v346_v23 }
 0x1aa   : > { %v343_v24 = vpop.xlane.xlu2 %342 }
 0x1ab   : > { %v345_v25 = vmul.f32 %v343_v24, %v327_v6 }
 0x1ad   : > { %v555_v26 = vpop.eup %554  ;;  %v347_v27 = vadd.f32 1e-05, %v345_v25 }
 0x1ae   : > { %v349_v28 = vmul.f32 %v555_v26, %v346_v23  ;;  %vm355_vm1 = vweird.f32 %v555_v26 }
 0x1af   : > { %556 = vrsqrt.f32 %v347_v27  ;;  %vm356_vm3 = vmor %vm354_vm2, %vm355_vm1  ;;  %vm364_vm7 = vweird.f32 %v347_v27 }
 0x1b0   : > { %v350_v29 = vmul.f32 %v555_v26, %v349_v28 }
 0x1b2   : > { %v351_v30 = vmul.f32 0.5, %v350_v29 }
 0x1b4   : > { %v352_v31 = vsub.f32 1.5, %v351_v30 }
 0x1b5   : > { %v557_v32 = vpop.eup %556 }
 0x1b6   : > { %v353_v33 = vmul.f32 %v555_v26, %v352_v31  ;;  %v359_v34 = vmul.f32 %v557_v32, %v347_v27  ;;  %vm365_vm6 = vweird.f32 %v557_v32 }
 0x1b7   : > { %vm366_vm8 = vmor %vm364_vm7, %vm365_vm6 }
 0x1b8   : > { %v357_v35 = vsel %vm356_vm3, %v555_v26, %v353_v33  ;;  %v360_v36 = vmul.f32 %v557_v32, %v359_v34 }
 0x1b9   : > { %v368_v37 = vmul.f32 %v357_v35, %v330_v9  ;;  %v369_v38 = vmul.f32 %v357_v35, %v331_v10 }
 0x1ba   : > { %v361_v39 = vmul.f32 0.5, %v360_v36 }
 0x1bb   : > { %vm372_vm4 = vcmp.gt.f32.partialorder %v368_v37, 0.0  ;;  %vm373_vm5 = vcmp.gt.f32.partialorder %v369_v38, 0.0  ;;  %v376_v40 = vmul.f32 0.2, %v368_v37  ;;  %v377_v41 = vmul.f32 0.2, %v369_v38 }
 0x1bc   : > { %v362_v42 = vsub.f32 1.5, %v361_v39 }
 0x1bd   : > { %v380_v43 = vsel %vm372_vm4, %v368_v37, %v376_v40  ;;  %v381_v44 = vsel %vm373_vm5, %v369_v38, %v377_v41 }
 0x1be   : > { %v384_v45 = vpack.c.bf16 %v381_v44, %v380_v43  ;;  %v363_v46 = vmul.f32 %v557_v32, %v362_v42 }
 0x1c0   : > { %386 = vst [vmem:[%s170_s27] sm:$0xff] %v384_v45  ;;  %v367_v47 = vsel %vm366_vm8, %v557_v32, %v363_v46 }
 0x1c1   : > { %v370_v48 = vmul.f32 %v367_v47, %v332_v16  ;;  %v371_v49 = vmul.f32 %v367_v47, %v333_v17 }
 0x1c3   : > { %vm374_vm9 = vcmp.gt.f32.partialorder %v370_v48, 0.0  ;;  %vm375_vm10 = vcmp.gt.f32.partialorder %v371_v49, 0.0  ;;  %v378_v50 = vmul.f32 0.2, %v370_v48  ;;  %v379_v51 = vmul.f32 0.2, %v371_v49 }
 0x1c5   : > { %v382_v52 = vsel %vm374_vm9, %v370_v48, %v378_v50  ;;  %v383_v53 = vsel %vm375_vm10, %v371_v49, %v379_v51 }
 0x1c6   : > { %v385_v54 = vpack.c.bf16 %v383_v53, %v382_v52 }
 0x1c8   : > { %387 = vst [vmem:[%s170_s27 + $0x8] sm:$0xff] %v385_v54 }
 0x1c9 PF: > { %s13_s12 = sadd.s32 1, %s564_s12  }
 0x1ca   : > { %p10_p4 = scmp.ge.s32.totalorder %s13_s12, 4  }
 0x1cc   :  { %12 = sbr.rel (!%p10_p4) target bundleno = 1 (0x1), region = 62 }

// kernel: discriminator_forward.6
= control target key start
LH: loop header
LB: loop body
LE: loop exit
PB: predicated region body
PF: predicated region fallthrough
CT: control target
= control target key end

     0   :  { %s738_s12 = smov 0   ;;  %s846_s0 = inlined_call_operand.vmem [shape: bf16[2,256,64], index: 0, kind: input, shape index: {}]   ;;  %s847_s1 = inlined_call_operand.vmem [shape: bf16[32,256], index: 1, kind: input, shape index: {}]   ;;  %s848_s2 = inlined_call_operand.vmem [shape: f32[32,1], index: 2, kind: input, shape index: {}]   ;;  %s849_s3 = inlined_call_operand.vmem [shape: bf16[2,32,64], index: 3, kind: output, shape index: {}]  }
   0x1 LB: > { %s557_s13 = sadd.s32 4294967295, %s714_s12   ;;  %p561_p0 = scmp.ge.s32.totalorder %s714_s12, 1  ;;  %s714_s12 = sphi %s738_s12, %s13_s12  }
   0x2   : > { %p137_p1 = scmp.lt.s32.totalorder %s714_s12, 3 }
   0x4   : > { %p138_p2 = pnand %p561_p0, %p137_p1 }
   0x5   : > { %p161_p3 = scmp.lt.s32.totalorder (!%p138_p2), %s557_s13, 1 }
   0x6   : > { %141 = sbr.rel (%p138_p2) target bundleno = 470 (0x1d6), region = 32 }
   0xb   : > { %s851_s13 = smov (!%p161_p3, %s557_s13), 1  ;;  %v716_v4 = vmov 0   ;;  %v207_v7 = vld [vmem:[%s848_s2] sm:$0xff]  ;;  %v209_v8 = vld [vmem:[%s848_s2 + $0x10] sm:$0xff]  ;;  %v208_v11 = vld [vmem:[%s848_s2 + $0x8] sm:$0xff]  ;;  %vm385_vm0 = vcmask 523264  }
   0xc   : > { %s648_s14 = sshll.u32 %s851_s13, 7  ;;  %696 = vset.pattern.permute.xlu0 %v716_v4  ;;  %697 = vset.pattern.permute.xlu1 %v716_v4  ;;  %v210_v12 = vld [vmem:[%s848_s2 + $0x18] sm:$0xff]  ;;  %v568_v19 = vld [vmem:[%s847_s1] sm:$0xf]  ;;  %v651_v21 = vld [vmem:[%s847_s1 + $0x4] sm:$0xf0] }
   0xd   : > { %s752_s17 = scalar_lea.vmem %s846_s0, %s648_s14  ;;  %213 = vperm.xlu0 %696, %v207_v7   ;;  %223 = vperm.xlu1 %697, %v209_v8   ;;  %v576_v22 = vld [vmem:[%s847_s1 + $0x10] sm:$0xf]  ;;  %v653_v24 = vld [vmem:[%s847_s1 + $0x14] sm:$0xf0]  ;;  %v650_v25 = vld [vmem:[%s847_s1 + $0x4] sm:$0xf]  ;;  %v569_v29 = vor.u32 %v651_v21, %v568_v19 }
   0xe   : > { %v661_v0 = vld [vmem:[%s752_s17 + $0x38] sm:$0xff]  ;;  %v660_v2 = vld [vmem:[%s752_s17 + $0x30] sm:$0xff]  ;;  %v659_v5 = vld [vmem:[%s752_s17 + $0x28] sm:$0xff]  ;;  %v577_v30 = vor.u32 %v653_v24, %v576_v22  ;;  %v717_v57 = vmov 64.0   ;;  %vm497_vm7 = vcmask 519168  }
   0xf   : > { %v669_v1 = vld [vmem:[%s752_s17 + $0x78] sm:$0xff]  ;;  %347 = vmatpush.bf16.msra.mxu0 %v661_v0  ;;  %670 = vmatpush.bf16.msra.mxu2 %v661_v0  ;;  %v668_v3 = vld [vmem:[%s752_s17 + $0x70] sm:$0xff]  ;;  %v667_v6 = vld [vmem:[%s752_s17 + $0x68] sm:$0xff]  ;;  %698 = vrcp.f32 %v717_v57 }
  0x10   : > { %366 = vmatpush.bf16.msra.mxu1 %v669_v1  ;;  %678 = vmatpush.bf16.msra.mxu3 %v669_v1  ;;  %v658_v9 = vld [vmem:[%s752_s17 + $0x20] sm:$0xff]  ;;  %v657_v13 = vld [vmem:[%s752_s17 + $0x18] sm:$0xff]  ;;  %v656_v15 = vld [vmem:[%s752_s17 + $0x10] sm:$0xff] }
  0x11   : > { %v666_v10 = vld [vmem:[%s752_s17 + $0x60] sm:$0xff]  ;;  %v665_v14 = vld [vmem:[%s752_s17 + $0x58] sm:$0xff]  ;;  %v664_v16 = vld [vmem:[%s752_s17 + $0x50] sm:$0xff] }
  0x12   : > { %v655_v17 = vld [vmem:[%s752_s17 + $0x8] sm:$0xff]  ;;  %v654_v20 = vld [vmem:[%s752_s17] sm:$0xff]  ;;  %v652_v27 = vld [vmem:[%s847_s1 + $0x14] sm:$0xf] }
  0x13   : > { %348 = vmatpush.bf16.msra.mxu0 %v660_v2  ;;  %671 = vmatpush.bf16.msra.mxu2 %v660_v2  ;;  %v663_v18 = vld [vmem:[%s752_s17 + $0x48] sm:$0xff]  ;;  %v662_v23 = vld [vmem:[%s752_s17 + $0x40] sm:$0xff]  ;;  %v578_v28 = vld [vmem:[%s847_s1 + $0x18] sm:$0xf0]  ;;  %s649_s17 = sshll.u32 %s851_s13, 4 }
  0x14   : > { %367 = vmatpush.bf16.msra.mxu1 %v668_v3  ;;  %679 = vmatpush.bf16.msra.mxu3 %v668_v3  ;;  %v570_v26 = vld [vmem:[%s847_s1 + $0x8] sm:$0xf0]  ;;  %v581_v32 = vor.u32 %v652_v27, %v578_v28  ;;  %s830_s20 = scalar_lea.vmem %s849_s3, %s649_s17 }
  0x15   : > { %218 = vperm.xlu0 %696, %v208_v11   ;;  %228 = vperm.xlu1 %697, %v210_v12   ;;  %v573_v31 = vor.u32 %v650_v25, %v570_v26  ;;  %v699_v58 = vpop.eup %698 }
  0x16   : > { %v399_v59 = vmul.f32 64.0, %v699_v58  ;;  %vm403_vm1 = vweird.f32 %v699_v58 }
  0x17   : > { %349 = vmatpush.bf16.msra.mxu0 %v659_v5  ;;  %672 = vmatpush.bf16.msra.mxu2 %v659_v5 }
  0x18   : > { %368 = vmatpush.bf16.msra.mxu1 %v667_v6  ;;  %680 = vmatpush.bf16.msra.mxu3 %v667_v6  ;;  %v400_v60 = vsub.f32 1.0, %v399_v59 }
  0x1a   : > { %v401_v61 = vmul.f32 %v699_v58, %v400_v60 }
  0x1b   : > { %350 = vmatpush.bf16.msra.mxu0 %v658_v9  ;;  %673 = vmatpush.bf16.msra.mxu2 %v658_v9 }
  0x1c   : > { %369 = vmatpush.bf16.msra.mxu1 %v666_v10  ;;  %681 = vmatpush.bf16.msra.mxu3 %v666_v10  ;;  %v402_v62 = vadd.f32 %v699_v58, %v401_v61 }
  0x1e   : > { %v404_v63 = vsel %vm403_vm1, %v699_v58, %v402_v62 }
  0x1f   : > { %351 = vmatpush.bf16.msra.mxu0 %v657_v13  ;;  %674 = vmatpush.bf16.msra.mxu2 %v657_v13 }
  0x20   : > { %370 = vmatpush.bf16.msra.mxu1 %v665_v14  ;;  %682 = vmatpush.bf16.msra.mxu3 %v665_v14 }
  0x23   : > { %352 = vmatpush.bf16.msra.mxu0 %v656_v15  ;;  %675 = vmatpush.bf16.msra.mxu2 %v656_v15 }
  0x24   : > { %371 = vmatpush.bf16.msra.mxu1 %v664_v16  ;;  %683 = vmatpush.bf16.msra.mxu3 %v664_v16 }
  0x27   : > { %353 = vmatpush.bf16.msra.mxu0 %v655_v17  ;;  %676 = vmatpush.bf16.msra.mxu2 %v655_v17 }
  0x28   : > { %372 = vmatpush.bf16.msra.mxu1 %v663_v18  ;;  %684 = vmatpush.bf16.msra.mxu3 %v663_v18 }
  0x2b   : > { %354 = vmatpush.bf16.msra.mxu0 %v654_v20  ;;  %677 = vmatpush.bf16.msra.mxu2 %v654_v20 }
  0x2c   : > { %373 = vmatpush.bf16.msra.mxu1 %v662_v23  ;;  %685 = vmatpush.bf16.msra.mxu3 %v662_v23 }
  0x2e   : > { %355 = vmatmul.bf16.vlgmr.msra.gmra.mxu0 %v569_v29  ;;  %360 = vmatmul.bf16.vlgmr.msra.gmra.mxu2 %v577_v30 }
  0x2f   : > { %374 = vmatmul.bf16.vlgmr.msra.gmra.mxu1 %v573_v31  ;;  %379 = vmatmul.bf16.vlgmr.msra.gmra.mxu3 %v581_v32 }
  0x7f   : > { %v214_v33 = vpop.permute.xlu0 %213  ;;  %v224_v38 = vpop.permute.xlu1 %223 }
  0x87   : > { %v219_v43 = vpop.permute.xlu0 %218  ;;  %v229_v51 = vpop.permute.xlu1 %228 }
  0xab   : > { %v356_v34 = vpop.f32.mrf.mxu0 }
  0xac   : > { %v357_v35 = vadd.f32 %v356_v34, %v214_v33  ;;  %v375_v36 = vpop.f32.mrf.mxu1 }
  0xae   : > { %v376_v37 = vadd.f32 %v375_v36, %v357_v35 }
  0xb0   : > { %v386_v39 = vsel %vm385_vm0, %v376_v37, 0.0 }
  0xb1   : > { %v361_v40 = vpop.f32.mrf.mxu2  ;;  %387 = vadd.xlane.f32.xlu2 %v386_v39 }
  0xb2   : > { %v362_v41 = vadd.f32 %v361_v40, %v224_v38  ;;  %v380_v42 = vpop.f32.mrf.mxu3 }
  0xb3   : > { %v358_v44 = vpop.f32.mrf.mxu0 }
  0xb4   : > { %v381_v45 = vadd.f32 %v380_v42, %v362_v41  ;;  %v359_v46 = vadd.f32 %v358_v44, %v219_v43  ;;  %v377_v47 = vpop.f32.mrf.mxu1 }
  0xb6   : > { %v378_v48 = vadd.f32 %v377_v47, %v359_v46  ;;  %v392_v49 = vsel %vm385_vm0, %v381_v45, 0.0 }
  0xb7   : > { %393 = vadd.xlane.f32.xlu0 %v392_v49 }
  0xb8   : > { %v389_v50 = vsel %vm385_vm0, %v378_v48, 0.0 }
  0xb9   : > { %v363_v52 = vpop.f32.mrf.mxu2  ;;  %390 = vadd.xlane.f32.xlu2 %v389_v50 }
  0xba   : > { %v364_v53 = vadd.f32 %v363_v52, %v229_v51  ;;  %v382_v54 = vpop.f32.mrf.mxu3 }
  0xbc   : > { %v383_v55 = vadd.f32 %v382_v54, %v364_v53 }
  0xbe   : > { %v395_v56 = vsel %vm385_vm0, %v383_v55, 0.0 }
  0xbf   : > { %396 = vadd.xlane.f32.xlu1 %v395_v56 }
 0x124   : > { %v388_v0 = vpop.xlane.xlu2 %387 }
 0x125   : > { %v405_v1 = vmul.f32 %v404_v63, %v388_v0 }
 0x127   : > { %v409_v2 = vsub.f32 %v376_v37, %v405_v1 }
 0x129   : > { %v413_v3 = vmul.f32 %v409_v2, %v409_v2 }
 0x12a   : > { %v394_v4 = vpop.xlane.xlu0 %393 }
 0x12b   : > { %v407_v5 = vmul.f32 %v404_v63, %v394_v4  ;;  %v417_v6 = vsel %vm385_vm0, %v413_v3, 0.0 }
 0x12c   : > { %418 = vadd.xlane.f32.xlu2 %v417_v6  ;;  %v391_v7 = vpop.xlane.xlu2 %390 }
 0x12d   : > { %v811_v8 = vsub.f32 %v381_v45, %v407_v5  ;;  %v406_v9 = vmul.f32 %v404_v63, %v391_v7 }
 0x12f   : > { %v415_v10 = vmul.f32 %v811_v8, %v811_v8  ;;  %v815_v11 = vsub.f32 %v378_v48, %v406_v9 }
 0x131   : > { %v423_v12 = vsel %vm385_vm0, %v415_v10, 0.0  ;;  %v414_v15 = vmul.f32 %v815_v11, %v815_v11 }
 0x132   : > { %v397_v13 = vpop.xlane.xlu1 %396 }
 0x133   : > { %v408_v14 = vmul.f32 %v404_v63, %v397_v13  ;;  %v420_v17 = vsel %vm385_vm0, %v414_v15, 0.0 }
 0x134   : > { %424 = vadd.xlane.f32.xlu2 %v423_v12 }
 0x135   : > { %v820_v16 = vsub.f32 %v383_v55, %v408_v14 }
 0x137   : > { %v416_v18 = vmul.f32 %v820_v16, %v820_v16 }
 0x139   : > { %v426_v19 = vsel %vm385_vm0, %v416_v18, 0.0 }
 0x13c   : > { %421 = vadd.xlane.f32.xlu2 %v420_v17 }
 0x144   : > { %427 = vadd.xlane.f32.xlu2 %v426_v19 }
 0x19f   : > { %v419_v20 = vpop.xlane.xlu2 %418 }
 0x1a0   : > { %v429_v21 = vmul.f32 %v419_v20, %v404_v63 }
 0x1a2   : > { %v433_v22 = vadd.f32 1e-05, %v429_v21 }
 0x1a4   : > { %700 = vrsqrt.f32 %v433_v22  ;;  %vm443_vm3 = vweird.f32 %v433_v22 }
 0x1a7   : > { %v425_v23 = vpop.xlane.xlu2 %424 }
 0x1a8   : > { %v431_v24 = vmul.f32 %v425_v23, %v404_v63 }
 0x1aa   : > { %v701_v25 = vpop.eup %700  ;;  %v435_v26 = vadd.f32 1e-05, %v431_v24 }
 0x1ab   : > { %v438_v27 = vmul.f32 %v701_v25, %v433_v22  ;;  %vm444_vm2 = vweird.f32 %v701_v25 }
 0x1ac   : > { %702 = vrsqrt.f32 %v435_v26  ;;  %vm445_vm4 = vmor %vm443_vm3, %vm444_vm2  ;;  %vm463_vm8 = vweird.f32 %v435_v26 }
 0x1ad   : > { %v439_v28 = vmul.f32 %v701_v25, %v438_v27 }
 0x1af   : > { %v440_v29 = vmul.f32 0.5, %v439_v28  ;;  %v422_v30 = vpop.xlane.xlu2 %421 }
 0x1b0   : > { %v430_v31 = vmul.f32 %v422_v30, %v404_v63 }
 0x1b1   : > { %v441_v32 = vsub.f32 1.5, %v440_v29 }
 0x1b2   : > { %v703_v33 = vpop.eup %702  ;;  %v434_v34 = vadd.f32 1e-05, %v430_v31 }
 0x1b3   : > { %v442_v35 = vmul.f32 %v701_v25, %v441_v32  ;;  %v458_v36 = vmul.f32 %v703_v33, %v435_v26  ;;  %vm464_vm6 = vweird.f32 %v703_v33 }
 0x1b4   : > { %704 = vrsqrt.f32 %v434_v34  ;;  %vm465_vm9 = vmor %vm463_vm8, %vm464_vm6  ;;  %vm453_vm12 = vweird.f32 %v434_v34 }
 0x1b5   : > { %v446_v37 = vsel %vm445_vm4, %v701_v25, %v442_v35  ;;  %v459_v38 = vmul.f32 %v703_v33, %v458_v36 }
 0x1b6   : > { %v477_v39 = vmul.f32 %v446_v37, %v409_v2 }
 0x1b7   : > { %v460_v40 = vmul.f32 0.5, %v459_v38  ;;  %v428_v41 = vpop.xlane.xlu2 %427 }
 0x1b8   : > { %vm481_vm5 = vcmp.gt.f32.partialorder %v477_v39, 0.0  ;;  %v485_v42 = vmul.f32 0.2, %v477_v39  ;;  %v432_v43 = vmul.f32 %v428_v41, %v404_v63 }
 0x1b9   : > { %v461_v44 = vsub.f32 1.5, %v460_v40 }
 0x1ba   : > { %v705_v45 = vpop.eup %704  ;;  %v489_v46 = vsel %vm481_vm5, %v477_v39, %v485_v42  ;;  %v436_v47 = vadd.f32 1e-05, %v432_v43 }
 0x1bb   : > { %v493_v48 = vpack.c.bf16 %v489_v46, %v489_v46  ;;  %v462_v49 = vmul.f32 %v703_v33, %v461_v44  ;;  %v448_v50 = vmul.f32 %v705_v45, %v434_v34  ;;  %vm454_vm11 = vweird.f32 %v705_v45 }
 0x1bc   : > { %706 = vrsqrt.f32 %v436_v47  ;;  %vm455_vm13 = vmor %vm453_vm12, %vm454_vm11  ;;  %vm473_vm0 = vweird.f32 %v436_v47 }
 0x1bd   : > { %498 = vst.msk [vmem:[%s830_s20] sm:$0xf] %vm497_vm7, %v493_v48  ;;  %v466_v51 = vsel %vm465_vm9, %v703_v33, %v462_v49  ;;  %v449_v52 = vmul.f32 %v705_v45, %v448_v50 }
 0x1be   : > { %v479_v53 = vmul.f32 %v466_v51, %v811_v8 }
 0x1bf   : > { %v450_v54 = vmul.f32 0.5, %v449_v52 }
 0x1c0   : > { %vm483_vm10 = vcmp.gt.f32.partialorder %v479_v53, 0.0  ;;  %v487_v55 = vmul.f32 0.2, %v479_v53 }
 0x1c1   : > { %v451_v56 = vsub.f32 1.5, %v450_v54 }
 0x1c2   : > { %v707_v57 = vpop.eup %706  ;;  %v491_v58 = vsel %vm483_vm10, %v479_v53, %v487_v55 }
 0x1c3   : > { %v495_v59 = vpack.c.bf16 %v491_v58, %v491_v58  ;;  %v452_v60 = vmul.f32 %v705_v45, %v451_v56  ;;  %v468_v61 = vmul.f32 %v707_v57, %v436_v47  ;;  %vm474_vm15 = vweird.f32 %v707_v57 }
 0x1c4   : > { %vm475_vm1 = vmor %vm473_vm0, %vm474_vm15 }
 0x1c5   : > { %500 = vst.msk [vmem:[%s830_s20 + $0x8] sm:$0xf] %vm497_vm7, %v495_v59  ;;  %v456_v62 = vsel %vm455_vm13, %v705_v45, %v452_v60  ;;  %v469_v63 = vmul.f32 %v707_v57, %v468_v61 }
 0x1c6   : > { %v478_v0 = vmul.f32 %v456_v62, %v815_v11 }
 0x1c7   : > { %v470_v1 = vmul.f32 0.5, %v469_v63 }
 0x1c8   : > { %vm482_vm14 = vcmp.gt.f32.partialorder %v478_v0, 0.0  ;;  %v486_v2 = vmul.f32 0.2, %v478_v0 }
 0x1c9   : > { %v471_v3 = vsub.f32 1.5, %v470_v1 }
 0x1ca   : > { %v490_v4 = vsel %vm482_vm14, %v478_v0, %v486_v2 }
 0x1cb   : > { %v494_v5 = vpack.c.bf16 %v490_v4, %v490_v4  ;;  %v472_v6 = vmul.f32 %v707_v57, %v471_v3 }
 0x1cd   : > { %499 = vst.msk [vmem:[%s830_s20 + $0x4] sm:$0xf] %vm497_vm7, %v494_v5  ;;  %v476_v7 = vsel %vm475_vm1, %v707_v57, %v472_v6 }
 0x1ce   : > { %v480_v8 = vmul.f32 %v476_v7, %v820_v16 }
 0x1d0   : > { %vm484_vm2 = vcmp.gt.f32.partialorder %v480_v8, 0.0  ;;  %v488_v9 = vmul.f32 0.2, %v480_v8 }
 0x1d2   : > { %v492_v10 = vsel %vm484_vm2, %v480_v8, %v488_v9 }
 0x1d3   : > { %v496_v11 = vpack.c.bf16 %v492_v10, %v492_v10 }
 0x1d5   : > { %501 = vst.msk [vmem:[%s830_s20 + $0xc] sm:$0xf] %vm497_vm7, %v496_v11 }
 0x1d6 PF: > { %s13_s12 = sadd.s32 1, %s714_s12  }
 0x1d7   : > { %p10_p4 = scmp.ge.s32.totalorder %s13_s12, 4  }
 0x1d9   :  { %12 = sbr.rel (!%p10_p4) target bundleno = 1 (0x1), region = 62 }

// kernel: discriminator_forward.7
= control target key start
LH: loop header
LB: loop body
LE: loop exit
PB: predicated region body
PF: predicated region fallthrough
CT: control target
= control target key end

     0   :  { %s1367_s20 = smov 0   ;;  %s1737_s0 = inlined_call_operand.vmem [shape: bf16[2,512,16], index: 0, kind: input, shape index: {}]   ;;  %s1738_s1 = inlined_call_operand.vmem [shape: bf16[64,512], index: 1, kind: input, shape index: {}]   ;;  %s1739_s2 = inlined_call_operand.vmem [shape: f32[64,1], index: 2, kind: input, shape index: {}]   ;;  %s1740_s3 = inlined_call_operand.vmem [shape: f32[64,16], index: 3, kind: input, shape index: {}]   ;;  %s1741_s4 = inlined_call_operand.<no memory space> [shape: f32[1,1], index: 4, kind: input, shape index: {}]   ;;  %s1742_s5 = inlined_call_operand.vmem [shape: f32[2,1,128], index: 5, kind: output, shape index: {}]  }
   0x1   :  { %v10_v0 = vstv %s1741_s4 }
   0x2   :  { %11 = vst [vmem:[#allocation2] sm:$0x1] %v10_v0 }
   0x3 LB: > { %s1039_s21 = sadd.s32 4294967295, %s1330_s20   ;;  %p1043_p0 = scmp.ge.s32.totalorder %s1330_s20, 1  ;;  %s1330_s20 = sphi %s1367_s20, %s17_s20  }
   0x4   : > { %p189_p1 = scmp.lt.s32.totalorder %s1330_s20, 3 }
   0x6   : > { %p190_p2 = pnand %p1043_p0, %p189_p1 }
   0x7   : > { %p215_p3 = scmp.lt.s32.totalorder (!%p190_p2), %s1039_s21, 1 }
   0x8   : > { %193 = sbr.rel (%p190_p2) target bundleno = 697 (0x2b9), region = 40 }
   0xd   : > { %s1748_s21 = smov (!%p215_p3, %s1039_s21), 1  ;;  %v1332_v9 = vmov 0   ;;  %v303_v18 = vld [vmem:[%s1739_s2] sm:$0xff]  ;;  %v304_v25 = vld [vmem:[%s1739_s2 + $0x8] sm:$0xff]  ;;  %v305_v26 = vld [vmem:[%s1739_s2 + $0x10] sm:$0xff]  ;;  %vm739_vm0 = vcmask 130048  }
   0xe   : > { %s1240_s4 = sshll.u32 %s1748_s21, 8  ;;  %1303 = vset.pattern.permute.xlu0 %v1332_v9  ;;  %1304 = vset.pattern.permute.xlu1 %v1332_v9  ;;  %v1048_v33 = vld [vmem:[%s1738_s1] sm:$0xf]  ;;  %v1243_v34 = vld [vmem:[%s1738_s1 + $0xc] sm:$0xf0]  ;;  %v306_v49 = vld [vmem:[%s1739_s2 + $0x18] sm:$0xff]  ;;  %s222_s29 = scalar_lea.vmem %s1742_s5, %s1748_s21 }
   0xf   : > { %s1381_s24 = scalar_lea.vmem %s1737_s0, %s1240_s4  ;;  %1305 = vset.pattern.permute.xlu2 %v1332_v9  ;;  %313 = vperm.xlu0 %1303, %v303_v18   ;;  %v1241_v35 = vld [vmem:[%s1738_s1 + $0x4] sm:$0xf]  ;;  %v1050_v40 = vld [vmem:[%s1738_s1 + $0x10] sm:$0xf0]  ;;  %v1056_v41 = vld [vmem:[%s1738_s1 + $0x8] sm:$0xf]  ;;  %v1049_v45 = vor.u32 %v1243_v34, %v1048_v33 }
  0x10   : > { %v1264_v1 = vld [vmem:[%s1381_s24 + $0x38] sm:$0xff]  ;;  %v1263_v5 = vld [vmem:[%s1381_s24 + $0x30] sm:$0xff]  ;;  %v1262_v10 = vld [vmem:[%s1381_s24 + $0x28] sm:$0xff]  ;;  %323 = vperm.xlu1 %1304, %v305_v26   ;;  %v1053_v46 = vor.u32 %v1241_v35, %v1050_v40 }
  0x11   : > { %v1272_v2 = vld [vmem:[%s1381_s24 + $0x78] sm:$0xff]  ;;  %623 = vmatpush.bf16.msra.mxu0 %v1264_v1  ;;  %v1271_v6 = vld [vmem:[%s1381_s24 + $0x70] sm:$0xff]  ;;  %v1270_v11 = vld [vmem:[%s1381_s24 + $0x68] sm:$0xff] }
  0x12   : > { %v1280_v3 = vld [vmem:[%s1381_s24 + $0xb8] sm:$0xff]  ;;  %652 = vmatpush.bf16.msra.mxu1 %v1272_v2  ;;  %v1279_v7 = vld [vmem:[%s1381_s24 + $0xb0] sm:$0xff]  ;;  %v1278_v12 = vld [vmem:[%s1381_s24 + $0xa8] sm:$0xff] }
  0x13   : > { %v1288_v4 = vld [vmem:[%s1381_s24 + $0xf8] sm:$0xff]  ;;  %681 = vmatpush.bf16.msra.mxu2 %v1280_v3  ;;  %v1287_v8 = vld [vmem:[%s1381_s24 + $0xf0] sm:$0xff]  ;;  %v1286_v13 = vld [vmem:[%s1381_s24 + $0xe8] sm:$0xff] }
  0x14   : > { %710 = vmatpush.bf16.msra.mxu3 %v1288_v4  ;;  %v1261_v14 = vld [vmem:[%s1381_s24 + $0x20] sm:$0xff]  ;;  %v1260_v19 = vld [vmem:[%s1381_s24 + $0x18] sm:$0xff]  ;;  %v1259_v23 = vld [vmem:[%s1381_s24 + $0x10] sm:$0xff] }
  0x15   : > { %624 = vmatpush.bf16.msra.mxu0 %v1263_v5  ;;  %v1269_v15 = vld [vmem:[%s1381_s24 + $0x60] sm:$0xff]  ;;  %v1268_v20 = vld [vmem:[%s1381_s24 + $0x58] sm:$0xff]  ;;  %v1267_v24 = vld [vmem:[%s1381_s24 + $0x50] sm:$0xff] }
  0x16   : > { %653 = vmatpush.bf16.msra.mxu1 %v1271_v6  ;;  %v1277_v16 = vld [vmem:[%s1381_s24 + $0xa0] sm:$0xff]  ;;  %v1276_v21 = vld [vmem:[%s1381_s24 + $0x98] sm:$0xff]  ;;  %v1275_v27 = vld [vmem:[%s1381_s24 + $0x90] sm:$0xff] }
  0x17   : > { %682 = vmatpush.bf16.msra.mxu2 %v1279_v7  ;;  %v1285_v17 = vld [vmem:[%s1381_s24 + $0xe0] sm:$0xff]  ;;  %v1284_v22 = vld [vmem:[%s1381_s24 + $0xd8] sm:$0xff]  ;;  %v1283_v28 = vld [vmem:[%s1381_s24 + $0xd0] sm:$0xff]  ;;  %318 = vperm.xlu0 %1303, %v304_v25  }
  0x18   : > { %711 = vmatpush.bf16.msra.mxu3 %v1287_v8  ;;  %v1258_v29 = vld [vmem:[%s1381_s24 + $0x8] sm:$0xff]  ;;  %v1257_v36 = vld [vmem:[%s1381_s24] sm:$0xff]  ;;  %v1244_v42 = vld [vmem:[%s1738_s1 + $0x14] sm:$0xf0]  ;;  %328 = vperm.xlu1 %1304, %v306_v49  }
  0x19   : > { %625 = vmatpush.bf16.msra.mxu0 %v1262_v10  ;;  %v1266_v30 = vld [vmem:[%s1381_s24 + $0x48] sm:$0xff]  ;;  %v1265_v37 = vld [vmem:[%s1381_s24 + $0x40] sm:$0xff]  ;;  %v1058_v44 = vld [vmem:[%s1738_s1 + $0x18] sm:$0xf0]  ;;  %v1057_v47 = vor.u32 %v1244_v42, %v1056_v41 }
  0x1a   : > { %654 = vmatpush.bf16.msra.mxu1 %v1270_v11  ;;  %v1274_v31 = vld [vmem:[%s1381_s24 + $0x88] sm:$0xff]  ;;  %v1273_v38 = vld [vmem:[%s1381_s24 + $0x80] sm:$0xff]  ;;  %v309_v50 = vld [vmem:[%s1739_s2 + $0x30] sm:$0xff] }
  0x1b   : > { %683 = vmatpush.bf16.msra.mxu2 %v1278_v12  ;;  %v1282_v32 = vld [vmem:[%s1381_s24 + $0xc8] sm:$0xff]  ;;  %v1281_v39 = vld [vmem:[%s1381_s24 + $0xc0] sm:$0xff]  ;;  %v310_v51 = vld [vmem:[%s1739_s2 + $0x38] sm:$0xff] }
  0x1c   : > { %712 = vmatpush.bf16.msra.mxu3 %v1286_v13  ;;  %v1242_v43 = vld [vmem:[%s1738_s1 + $0xc] sm:$0xf]  ;;  %v1064_v52 = vld [vmem:[%s1738_s1 + $0x20] sm:$0xf]  ;;  %v1247_v53 = vld [vmem:[%s1738_s1 + $0x2c] sm:$0xf0] }
  0x1d   : > { %626 = vmatpush.bf16.msra.mxu0 %v1261_v14  ;;  %v1061_v48 = vor.u32 %v1242_v43, %v1058_v44  ;;  %v1245_v54 = vld [vmem:[%s1738_s1 + $0x24] sm:$0xf]  ;;  %v1066_v55 = vld [vmem:[%s1738_s1 + $0x30] sm:$0xf0]  ;;  %v1072_v56 = vld [vmem:[%s1738_s1 + $0x28] sm:$0xf]  ;;  %v1065_v60 = vor.u32 %v1247_v53, %v1064_v52 }
  0x1e   : > { %655 = vmatpush.bf16.msra.mxu1 %v1269_v15  ;;  %v1248_v57 = vld [vmem:[%s1738_s1 + $0x34] sm:$0xf0]  ;;  %v1246_v58 = vld [vmem:[%s1738_s1 + $0x2c] sm:$0xf]  ;;  %v1074_v59 = vld [vmem:[%s1738_s1 + $0x38] sm:$0xf0]  ;;  %v1069_v61 = vor.u32 %v1245_v54, %v1066_v55 }
  0x1f   : > { %684 = vmatpush.bf16.msra.mxu2 %v1277_v16  ;;  %343 = vperm.xlu0 %1303, %v309_v50   ;;  %v1073_v62 = vor.u32 %v1248_v57, %v1072_v56  ;;  %v1077_v63 = vor.u32 %v1246_v58, %v1074_v59  ;;  %v307_v0 = vld [vmem:[%s1739_s2 + $0x20] sm:$0xff]  ;;  %v308_v1 = vld [vmem:[%s1739_s2 + $0x28] sm:$0xff]  ;;  %v1251_v3 = vld [vmem:[%s1738_s1 + $0x4c] sm:$0xf0] }
  0x20   : > { %713 = vmatpush.bf16.msra.mxu3 %v1285_v17  ;;  %348 = vperm.xlu1 %1304, %v310_v51   ;;  %v1080_v2 = vld [vmem:[%s1738_s1 + $0x40] sm:$0xf]  ;;  %v1249_v4 = vld [vmem:[%s1738_s1 + $0x44] sm:$0xf]  ;;  %v1082_v5 = vld [vmem:[%s1738_s1 + $0x50] sm:$0xf0] }
  0x21   : > { %627 = vmatpush.bf16.msra.mxu0 %v1260_v19  ;;  %333 = vperm.xlu2 %1305, %v307_v0   ;;  %v1088_v6 = vld [vmem:[%s1738_s1 + $0x48] sm:$0xf]  ;;  %v1252_v7 = vld [vmem:[%s1738_s1 + $0x54] sm:$0xf0]  ;;  %v1250_v8 = vld [vmem:[%s1738_s1 + $0x4c] sm:$0xf]  ;;  %v1081_v10 = vor.u32 %v1251_v3, %v1080_v2  ;;  %v1085_v11 = vor.u32 %v1249_v4, %v1082_v5 }
  0x22   : > { %656 = vmatpush.bf16.msra.mxu1 %v1268_v20  ;;  %v1090_v9 = vld [vmem:[%s1738_s1 + $0x58] sm:$0xf0]  ;;  %v1089_v12 = vor.u32 %v1252_v7, %v1088_v6  ;;  %v1096_v14 = vld [vmem:[%s1738_s1 + $0x60] sm:$0xf]  ;;  %v1255_v15 = vld [vmem:[%s1738_s1 + $0x6c] sm:$0xf0] }
  0x23   : > { %685 = vmatpush.bf16.msra.mxu2 %v1276_v21  ;;  %v1093_v13 = vor.u32 %v1250_v8, %v1090_v9  ;;  %v1253_v16 = vld [vmem:[%s1738_s1 + $0x64] sm:$0xf]  ;;  %v1098_v17 = vld [vmem:[%s1738_s1 + $0x70] sm:$0xf0]  ;;  %v1104_v18 = vld [vmem:[%s1738_s1 + $0x68] sm:$0xf] }
  0x24   : > { %714 = vmatpush.bf16.msra.mxu3 %v1284_v22  ;;  %v1256_v19 = vld [vmem:[%s1738_s1 + $0x74] sm:$0xf0]  ;;  %v1254_v20 = vld [vmem:[%s1738_s1 + $0x6c] sm:$0xf]  ;;  %v1106_v21 = vld [vmem:[%s1738_s1 + $0x78] sm:$0xf0]  ;;  %v1097_v22 = vor.u32 %v1255_v15, %v1096_v14 }
  0x25   : > { %628 = vmatpush.bf16.msra.mxu0 %v1259_v23  ;;  %v1101_v23 = vor.u32 %v1253_v16, %v1098_v17  ;;  %v1109_v25 = vor.u32 %v1254_v20, %v1106_v21 }
  0x26   : > { %657 = vmatpush.bf16.msra.mxu1 %v1267_v24  ;;  %v1105_v24 = vor.u32 %v1256_v19, %v1104_v18 }
  0x27   : > { %686 = vmatpush.bf16.msra.mxu2 %v1275_v27 }
  0x28   : > { %715 = vmatpush.bf16.msra.mxu3 %v1283_v28 }
  0x29   : > { %629 = vmatpush.bf16.msra.mxu0 %v1258_v29  ;;  %338 = vperm.xlu2 %1305, %v308_v1  }
  0x2a   : > { %658 = vmatpush.bf16.msra.mxu1 %v1266_v30 }
  0x2b   : > { %687 = vmatpush.bf16.msra.mxu2 %v1274_v31 }
  0x2c   : > { %716 = vmatpush.bf16.msra.mxu3 %v1282_v32 }
  0x2d   : > { %630 = vmatpush.bf16.msra.mxu0 %v1257_v36 }
  0x2e   : > { %659 = vmatpush.bf16.msra.mxu1 %v1265_v37 }
  0x2f   : > { %688 = vmatpush.bf16.msra.mxu2 %v1273_v38 }
  0x30   : > { %717 = vmatpush.bf16.msra.mxu3 %v1281_v39  ;;  %631 = vmatmul.bf16.vlgmr.msra.gmra.mxu0 %v1049_v45 }
  0x31   : > { %660 = vmatmul.bf16.vlgmr.msra.gmra.mxu1 %v1053_v46 }
  0x32   : > { %689 = vmatmul.bf16.vlgmr.msra.gmra.mxu2 %v1057_v47 }
  0x33   : > { %718 = vmatmul.bf16.vlgmr.msra.gmra.mxu3 %v1061_v48 }
  0x40   : > { %636 = vmatmul.bf16.gmra.mxu0 %v1065_v60 }
  0x41   : > { %665 = vmatmul.bf16.gmra.mxu1 %v1069_v61 }
  0x42   : > { %694 = vmatmul.bf16.gmra.mxu2 %v1073_v62 }
  0x43   : > { %723 = vmatmul.bf16.gmra.mxu3 %v1077_v63 }
  0x50   : > { %641 = vmatmul.bf16.gmra.mxu0 %v1081_v10 }
  0x51   : > { %670 = vmatmul.bf16.gmra.mxu1 %v1085_v11 }
  0x52   : > { %699 = vmatmul.bf16.gmra.mxu2 %v1089_v12 }
  0x53   : > { %728 = vmatmul.bf16.gmra.mxu3 %v1093_v13 }
  0x60   : > { %646 = vmatmul.bf16.gmra.mxu0 %v1097_v22 }
  0x61   : > { %675 = vmatmul.bf16.gmra.mxu1 %v1101_v23 }
  0x62   : > { %704 = vmatmul.bf16.gmra.mxu2 %v1105_v24 }
  0x63   : > { %733 = vmatmul.bf16.gmra.mxu3 %v1109_v25 }
  0x7b   : > { %v334_v60 = vpop.permute.xlu2 %333 }
  0x81   : > { %v314_v26 = vpop.permute.xlu0 %313 }
  0x82   : > { %v324_v40 = vpop.permute.xlu1 %323 }
  0x83   : > { %v339_v7 = vpop.permute.xlu2 %338 }
  0x89   : > { %v319_v31 = vpop.permute.xlu0 %318 }
  0x8a   : > { %v329_v51 = vpop.permute.xlu1 %328 }
  0x91   : > { %v344_v21 = vpop.permute.xlu0 %343 }
  0xad   : > { %v632_v27 = vpop.f32.mrf.mxu0 }
  0xae   : > { %v661_v28 = vpop.f32.mrf.mxu1  ;;  %v633_v29 = vadd.f32 %v632_v27, %v314_v26 }
  0xb0   : > { %v662_v30 = vadd.f32 %v661_v28, %v633_v29 }
  0xb5   : > { %v690_v32 = vpop.f32.mrf.mxu2  ;;  %v634_v35 = vpop.f32.mrf.mxu0 }
  0xb6   : > { %v719_v33 = vpop.f32.mrf.mxu3  ;;  %v691_v34 = vadd.f32 %v690_v32, %v662_v30  ;;  %v663_v36 = vpop.f32.mrf.mxu1  ;;  %v635_v38 = vadd.f32 %v634_v35, %v319_v31 }
  0xb7   : > { %v349_v31 = vpop.permute.xlu1 %348 }
  0xb8   : > { %v1535_v37 = vadd.f32 %v719_v33, %v691_v34  ;;  %v664_v41 = vadd.f32 %v663_v36, %v635_v38 }
  0xba   : > { %v740_v39 = vsel %vm739_vm0, %v1535_v37, 0.0 }
  0xbb   : > { %741 = vadd.xlane.f32.xlu2 %v740_v39 }
  0xbd   : > { %v692_v42 = vpop.f32.mrf.mxu2  ;;  %v637_v45 = vpop.f32.mrf.mxu0 }
  0xbe   : > { %v721_v43 = vpop.f32.mrf.mxu3  ;;  %v693_v44 = vadd.f32 %v692_v42, %v664_v41  ;;  %v666_v46 = vpop.f32.mrf.mxu1  ;;  %v638_v47 = vadd.f32 %v637_v45, %v324_v40 }
  0xc0   : > { %v1539_v48 = vadd.f32 %v721_v43, %v693_v44  ;;  %v667_v49 = vadd.f32 %v666_v46, %v638_v47  ;;  %v1333_v43 = vmov 16.0  }
  0xc1   : > { %1306 = vrcp.f32 %v1333_v43 }
  0xc2   : > { %v743_v50 = vsel %vm739_vm0, %v1539_v48, 0.0 }
  0xc3   : > { %744 = vadd.xlane.f32.xlu0 %v743_v50 }
  0xc5   : > { %v695_v52 = vpop.f32.mrf.mxu2  ;;  %v639_v55 = vpop.f32.mrf.mxu0 }
  0xc6   : > { %v724_v53 = vpop.f32.mrf.mxu3  ;;  %v696_v54 = vadd.f32 %v695_v52, %v667_v49  ;;  %v668_v56 = vpop.f32.mrf.mxu1  ;;  %v640_v58 = vadd.f32 %v639_v55, %v329_v51 }
  0xc7   : > { %v1307_v44 = vpop.eup %1306 }
  0xc8   : > { %v1543_v57 = vadd.f32 %v724_v53, %v696_v54  ;;  %v669_v61 = vadd.f32 %v668_v56, %v640_v58  ;;  %v765_v45 = vmul.f32 16.0, %v1307_v44  ;;  %vm769_vm1 = vweird.f32 %v1307_v44 }
  0xca   : > { %v746_v59 = vsel %vm739_vm0, %v1543_v57, 0.0  ;;  %v766_v46 = vsub.f32 1.0, %v765_v45 }
  0xcb   : > { %747 = vadd.xlane.f32.xlu1 %v746_v59 }
  0xcc   : > { %v767_v47 = vmul.f32 %v1307_v44, %v766_v46 }
  0xcd   : > { %v697_v62 = vpop.f32.mrf.mxu2  ;;  %v642_v1 = vpop.f32.mrf.mxu0 }
  0xce   : > { %v726_v63 = vpop.f32.mrf.mxu3  ;;  %v698_v0 = vadd.f32 %v697_v62, %v669_v61  ;;  %v671_v2 = vpop.f32.mrf.mxu1  ;;  %v643_v3 = vadd.f32 %v642_v1, %v334_v60  ;;  %v768_v49 = vadd.f32 %v1307_v44, %v767_v47 }
  0xd0   : > { %v1547_v4 = vadd.f32 %v726_v63, %v698_v0  ;;  %v672_v5 = vadd.f32 %v671_v2, %v643_v3  ;;  %v1561_v50 = vsel %vm769_vm1, %v1307_v44, %v768_v49 }
  0xd2   : > { %v749_v6 = vsel %vm739_vm0, %v1547_v4, 0.0 }
  0xd3   : > { %750 = vadd.xlane.f32.xlu2 %v749_v6 }
  0xd5   : > { %v700_v8 = vpop.f32.mrf.mxu2  ;;  %v644_v11 = vpop.f32.mrf.mxu0 }
  0xd6   : > { %v729_v9 = vpop.f32.mrf.mxu3  ;;  %v701_v10 = vadd.f32 %v700_v8, %v672_v5  ;;  %v673_v12 = vpop.f32.mrf.mxu1  ;;  %v645_v14 = vadd.f32 %v644_v11, %v339_v7 }
  0xd8   : > { %v1551_v13 = vadd.f32 %v729_v9, %v701_v10  ;;  %v674_v16 = vadd.f32 %v673_v12, %v645_v14 }
  0xda   : > { %v752_v15 = vsel %vm739_vm0, %v1551_v13, 0.0 }
  0xdb   : > { %753 = vadd.xlane.f32.xlu2 %v752_v15 }
  0xdd   : > { %v702_v17 = vpop.f32.mrf.mxu2  ;;  %v647_v20 = vpop.f32.mrf.mxu0 }
  0xde   : > { %v731_v18 = vpop.f32.mrf.mxu3  ;;  %v703_v19 = vadd.f32 %v702_v17, %v674_v16  ;;  %v648_v23 = vadd.f32 %v647_v20, %v344_v21  ;;  %v676_v24 = vpop.f32.mrf.mxu1 }
  0xe0   : > { %v1555_v22 = vadd.f32 %v731_v18, %v703_v19  ;;  %v677_v26 = vadd.f32 %v676_v24, %v648_v23 }
  0xe2   : > { %v755_v25 = vsel %vm739_vm0, %v1555_v22, 0.0 }
  0xe3   : > { %756 = vadd.xlane.f32.xlu0 %v755_v25 }
  0xe5   : > { %v705_v27 = vpop.f32.mrf.mxu2  ;;  %v649_v30 = vpop.f32.mrf.mxu0 }
  0xe6   : > { %v734_v28 = vpop.f32.mrf.mxu3  ;;  %v706_v29 = vadd.f32 %v705_v27, %v677_v26  ;;  %v650_v33 = vadd.f32 %v649_v30, %v349_v31  ;;  %v678_v35 = vpop.f32.mrf.mxu1 }
  0xe8   : > { %v735_v32 = vadd.f32 %v734_v28, %v706_v29  ;;  %v679_v36 = vadd.f32 %v678_v35, %v650_v33 }
  0xea   : > { %v758_v34 = vsel %vm739_vm0, %v735_v32, 0.0 }
  0xeb   : > { %759 = vadd.xlane.f32.xlu1 %v758_v34 }
  0xed   : > { %v707_v38 = vpop.f32.mrf.mxu2 }
  0xee   : > { %v708_v39 = vadd.f32 %v707_v38, %v679_v36  ;;  %v736_v40 = vpop.f32.mrf.mxu3 }
  0xf0   : > { %v737_v41 = vadd.f32 %v736_v40, %v708_v39 }
  0xf2   : > { %v761_v42 = vsel %vm739_vm0, %v737_v41, 0.0 }
  0xf3   : > { %762 = vadd.xlane.f32.xlu2 %v761_v42 }
 0x12e   : > { %v742_v51 = vpop.xlane.xlu2 %741 }
 0x12f   : > { %v771_v52 = vmul.f32 %v1561_v50, %v742_v51 }
 0x131   : > { %v1565_v53 = vsub.f32 %v1535_v37, %v771_v52 }
 0x133   : > { %v787_v54 = vmul.f32 %v1565_v53, %v1565_v53 }
 0x135   : > { %v795_v55 = vsel %vm739_vm0, %v787_v54, 0.0 }
 0x136   : > { %v745_v56 = vpop.xlane.xlu0 %744  ;;  %796 = vadd.xlane.f32.xlu0 %v795_v55 }
 0x137   : > { %v772_v58 = vmul.f32 %v1561_v50, %v745_v56 }
 0x139   : > { %v1572_v59 = vsub.f32 %v1539_v48, %v772_v58 }
 0x13b   : > { %v788_v60 = vmul.f32 %v1572_v59, %v1572_v59 }
 0x13d   : > { %v798_v61 = vsel %vm739_vm0, %v788_v60, 0.0 }
 0x13e   : > { %v748_v62 = vpop.xlane.xlu1 %747  ;;  %799 = vadd.xlane.f32.xlu1 %v798_v61 }
 0x13f   : > { %v773_v37 = vmul.f32 %v1561_v50, %v748_v62 }
 0x141   : > { %v1579_v63 = vsub.f32 %v1543_v57, %v773_v37 }
 0x143   : > { %v789_v0 = vmul.f32 %v1579_v63, %v1579_v63 }
 0x145   : > { %v801_v1 = vsel %vm739_vm0, %v789_v0, 0.0 }
 0x146   : > { %802 = vadd.xlane.f32.xlu2 %v801_v1  ;;  %v751_v48 = vpop.xlane.xlu2 %750 }
 0x147   : > { %v774_v2 = vmul.f32 %v1561_v50, %v751_v48 }
 0x149   : > { %v1586_v3 = vsub.f32 %v1547_v4, %v774_v2 }
 0x14b   : > { %v790_v5 = vmul.f32 %v1586_v3, %v1586_v3 }
 0x14d   : > { %v804_v6 = vsel %vm739_vm0, %v790_v5, 0.0 }
 0x14e   : > { %805 = vadd.xlane.f32.xlu0 %v804_v6  ;;  %v754_v57 = vpop.xlane.xlu2 %753 }
 0x14f   : > { %v775_v7 = vmul.f32 %v1561_v50, %v754_v57 }
 0x151   : > { %v1593_v8 = vsub.f32 %v1551_v13, %v775_v7 }
 0x153   : > { %v791_v9 = vmul.f32 %v1593_v8, %v1593_v8 }
 0x155   : > { %v807_v10 = vsel %vm739_vm0, %v791_v9, 0.0 }
 0x156   : > { %v757_v11 = vpop.xlane.xlu0 %756  ;;  %808 = vadd.xlane.f32.xlu1 %v807_v10 }
 0x157   : > { %v776_v4 = vmul.f32 %v1561_v50, %v757_v11 }
 0x159   : > { %v1600_v12 = vsub.f32 %v1555_v22, %v776_v4 }
 0x15b   : > { %v792_v14 = vmul.f32 %v1600_v12, %v1600_v12 }
 0x15d   : > { %v810_v15 = vsel %vm739_vm0, %v792_v14, 0.0 }
 0x15e   : > { %v760_v16 = vpop.xlane.xlu1 %759  ;;  %811 = vadd.xlane.f32.xlu2 %v810_v15 }
 0x15f   : > { %v777_v13 = vmul.f32 %v1561_v50, %v760_v16 }
 0x161   : > { %v1606_v17 = vsub.f32 %v735_v32, %v777_v13 }
 0x163   : > { %v793_v18 = vmul.f32 %v1606_v17, %v1606_v17 }
 0x165   : > { %v813_v19 = vsel %vm739_vm0, %v793_v18, 0.0 }
 0x166   : > { %814 = vadd.xlane.f32.xlu0 %v813_v19  ;;  %v763_v20 = vpop.xlane.xlu2 %762 }
 0x167   : > { %v778_v21 = vmul.f32 %v1561_v50, %v763_v20 }
 0x169   : > { %v1612_v22 = vsub.f32 %v737_v41, %v778_v21 }
 0x16b   : > { %v794_v23 = vmul.f32 %v1612_v22, %v1612_v22 }
 0x16d   : > { %v816_v24 = vsel %vm739_vm0, %v794_v23, 0.0 }
 0x16e   : > { %817 = vadd.xlane.f32.xlu1 %v816_v24 }
 0x1a9   : > { %v797_v26 = vpop.xlane.xlu0 %796 }
 0x1aa   : > { %v819_v29 = vmul.f32 %v797_v26, %v1561_v50 }
 0x1ac   : > { %v827_v32 = vadd.f32 1e-05, %v819_v29 }
 0x1ae   : > { %vm841_vm5 = vweird.f32 %v827_v32 }
 0x1b1   : > { %v800_v25 = vpop.xlane.xlu1 %799 }
 0x1b2   : > { %v820_v27 = vmul.f32 %v800_v25, %v1561_v50 }
 0x1b4   : > { %v828_v30 = vadd.f32 1e-05, %v820_v27 }
 0x1b6   : > { %1308 = vrsqrt.f32 %v828_v30  ;;  %vm851_vm4 = vweird.f32 %v828_v30 }
 0x1b7   : > { %1310 = vrsqrt.f32 %v827_v32 }
 0x1b9   : > { %v803_v28 = vpop.xlane.xlu2 %802 }
 0x1ba   : > { %v821_v31 = vmul.f32 %v803_v28, %v1561_v50 }
 0x1bc   : > { %v1620_v33 = vadd.f32 1e-05, %v821_v31  ;;  %v1309_v38 = vpop.eup %1308 }
 0x1bd   : > { %v1627_v39 = vpop.eup %1310  ;;  %v846_v40 = vmul.f32 %v1309_v38, %v828_v30  ;;  %vm852_vm2 = vweird.f32 %v1309_v38 }
 0x1be   : > { %1312 = vrsqrt.f32 %v1620_v33  ;;  %v836_v44 = vmul.f32 %v1627_v39, %v827_v32  ;;  %vm842_vm3 = vweird.f32 %v1627_v39  ;;  %vm853_vm6 = vmor %vm851_vm4, %vm852_vm2  ;;  %vm861_vm9 = vweird.f32 %v1620_v33 }
 0x1bf   : > { %v847_v47 = vmul.f32 %v1309_v38, %v846_v40  ;;  %vm843_vm8 = vmor %vm841_vm5, %vm842_vm3 }
 0x1c0   : > { %v837_v51 = vmul.f32 %v1627_v39, %v836_v44 }
 0x1c1   : > { %v806_v34 = vpop.xlane.xlu0 %805  ;;  %v848_v54 = vmul.f32 0.5, %v847_v47 }
 0x1c2   : > { %v822_v35 = vmul.f32 %v806_v34, %v1561_v50  ;;  %v838_v60 = vmul.f32 0.5, %v837_v51 }
 0x1c3   : > { %v849_v0 = vsub.f32 1.5, %v848_v54 }
 0x1c4   : > { %v1624_v36 = vadd.f32 1e-05, %v822_v35  ;;  %v1629_v42 = vpop.eup %1312  ;;  %v839_v2 = vsub.f32 1.5, %v838_v60 }
 0x1c5   : > { %v856_v49 = vmul.f32 %v1629_v42, %v1620_v33  ;;  %v850_v57 = vmul.f32 %v1309_v38, %v849_v0  ;;  %vm862_vm7 = vweird.f32 %v1629_v42 }
 0x1c6   : > { %1314 = vrsqrt.f32 %v1624_v36  ;;  %v840_v4 = vmul.f32 %v1627_v39, %v839_v2  ;;  %vm1664_vm11 = vmor %vm861_vm9, %vm862_vm7  ;;  %vm871_vm12 = vweird.f32 %v1624_v36 }
 0x1c7   : > { %v857_v55 = vmul.f32 %v1629_v42, %v856_v49  ;;  %v854_v13 = vsel %vm853_vm6, %v1309_v38, %v850_v57 }
 0x1c8   : > { %v844_v21 = vsel %vm843_vm8, %v1627_v39, %v840_v4  ;;  %v916_v25 = vmul.f32 %v854_v13, %v1572_v59 }
 0x1c9   : > { %v809_v41 = vpop.xlane.xlu1 %808  ;;  %v858_v1 = vmul.f32 0.5, %v857_v55  ;;  %v915_v31 = vmul.f32 %v844_v21, %v1565_v53  ;;  %v953_v21 = vld [vmem:[%s1740_s3 + $0x30] sm:$0xff] }
 0x1ca   : > { %v823_v43 = vmul.f32 %v809_v41, %v1561_v50  ;;  %vm924_vm4 = vcmp.gt.f32.partialorder %v916_v25, 0.0 }
 0x1cb   : > { %v859_v7 = vsub.f32 1.5, %v858_v1  ;;  %vm923_vm6 = vcmp.gt.f32.partialorder %v915_v31, 0.0 }
 0x1cc   : > { %v1633_v45 = vpop.eup %1314  ;;  %v1635_v46 = vadd.f32 1e-05, %v823_v43 }
 0x1cd   : > { %v866_v52 = vmul.f32 %v1633_v45, %v1624_v36  ;;  %v860_v18 = vmul.f32 %v1629_v42, %v859_v7  ;;  %vm872_vm10 = vweird.f32 %v1633_v45  ;;  %v932_v36 = vmul.f32 0.2, %v916_v25 }
 0x1ce   : > { %1316 = vrsqrt.f32 %v1635_v46  ;;  %vm1675_vm14 = vmor %vm871_vm12, %vm872_vm10  ;;  %vm881_vm15 = vweird.f32 %v1635_v46 }
 0x1cf   : > { %v867_v61 = vmul.f32 %v1633_v45, %v866_v52  ;;  %v864_v27 = vsel %vm1664_vm11, %v1629_v42, %v860_v18  ;;  %v931_v42 = vmul.f32 0.2, %v915_v31  ;;  %v940_v47 = vsel %vm924_vm4, %v916_v25, %v932_v36  ;;  %v947_v52 = vld [vmem:[%s1740_s3] sm:$0xff] }
 0x1d0   : > { %v917_v38 = vmul.f32 %v864_v27, %v1579_v63 }
 0x1d1   : > { %v812_v56 = vpop.xlane.xlu2 %811  ;;  %v868_v5 = vmul.f32 0.5, %v867_v61  ;;  %v939_v54 = vsel %vm923_vm6, %v915_v31, %v931_v42  ;;  %v949_v61 = vld [vmem:[%s1740_s3 + $0x10] sm:$0xff] }
 0x1d2   : > { %v824_v58 = vmul.f32 %v812_v56, %v1561_v50  ;;  %v933_v63 = vmul.f32 0.2, %v917_v38  ;;  %vm925_vm7 = vcmp.gt.f32.partialorder %v917_v38, 0.0 }
 0x1d3   : > { %v869_v14 = vsub.f32 1.5, %v868_v5 }
 0x1d4   : > { %v1646_v62 = vpop.eup %1316  ;;  %v832_v37 = vadd.f32 1e-05, %v824_v58  ;;  %v941_v58 = vsel %vm925_vm7, %v917_v38, %v933_v63 }
 0x1d5   : > { %v876_v48 = vmul.f32 %v1646_v62, %v1635_v46  ;;  %v870_v23 = vmul.f32 %v1633_v45, %v869_v14  ;;  %vm882_vm13 = vweird.f32 %v1646_v62  ;;  %v948_v46 = vld [vmem:[%s1740_s3 + $0x8] sm:$0xff] }
 0x1d6   : > { %1318 = vrsqrt.f32 %v832_v37  ;;  %vm883_vm2 = vmor %vm881_vm15, %vm882_vm13  ;;  %vm891_vm3 = vweird.f32 %v832_v37 }
 0x1d7   : > { %v877_v6 = vmul.f32 %v1646_v62, %v876_v48  ;;  %v874_v33 = vsel %vm1675_vm14, %v1633_v45, %v870_v23  ;;  %v950_v48 = vld [vmem:[%s1740_s3 + $0x18] sm:$0xff] }
 0x1d8   : > { %v918_v41 = vmul.f32 %v874_v33, %v1586_v3 }
 0x1d9   : > { %v878_v9 = vmul.f32 0.5, %v877_v6  ;;  %v815_v10 = vpop.xlane.xlu0 %814  ;;  %v957_v6 = vmul.f32 %v949_v61, %v941_v58 }
 0x1da   : > { %v825_v11 = vmul.f32 %v815_v10, %v1561_v50  ;;  %v934_v51 = vmul.f32 0.2, %v918_v41  ;;  %vm926_vm8 = vcmp.gt.f32.partialorder %v918_v41, 0.0 }
 0x1db   : > { %v879_v19 = vsub.f32 1.5, %v878_v9  ;;  %v951_v9 = vld [vmem:[%s1740_s3 + $0x20] sm:$0xff] }
 0x1dc   : > { %v1319_v15 = vpop.eup %1318  ;;  %v1655_v16 = vadd.f32 1e-05, %v825_v11  ;;  %v942_v1 = vsel %vm926_vm8, %v918_v41, %v934_v51 }
 0x1dd   : > { %v886_v20 = vmul.f32 %v1319_v15, %v832_v37  ;;  %v880_v28 = vmul.f32 %v1646_v62, %v879_v19  ;;  %vm892_vm1 = vweird.f32 %v1319_v15  ;;  %v955_v37 = vmul.f32 %v947_v52, %v939_v54 }
 0x1de   : > { %1320 = vrsqrt.f32 %v1655_v16  ;;  %vm893_vm5 = vmor %vm891_vm3, %vm892_vm1  ;;  %vm901_vm10 = vweird.f32 %v1655_v16  ;;  %v958_v11 = vmul.f32 %v950_v48, %v942_v1  ;;  %v966_v19 = vsel %vm739_vm0, %v957_v6, 0.0 }
 0x1df   : > { %v887_v24 = vmul.f32 %v1319_v15, %v886_v20  ;;  %v884_v39 = vsel %vm883_vm2, %v1646_v62, %v880_v28  ;;  %v963_v13 = vsel %vm739_vm0, %v955_v37, 0.0 }
 0x1e0   : > { %v919_v45 = vmul.f32 %v884_v39, %v1593_v8  ;;  %v956_v8 = vmul.f32 %v948_v46, %v940_v47  ;;  %v968_v26 = vsel %vm739_vm0, %v958_v11, 0.0  ;;  %v987_v47 = vld [vmem:[#allocation2] sm:$0x1] }
 0x1e1   : > { %v888_v29 = vmul.f32 0.5, %v887_v24  ;;  %v818_v30 = vpop.xlane.xlu1 %817 }
 0x1e2   : > { %v826_v32 = vmul.f32 %v818_v30, %v1561_v50  ;;  %v935_v60 = vmul.f32 0.2, %v919_v45  ;;  %vm927_vm11 = vcmp.gt.f32.partialorder %v919_v45, 0.0  ;;  %v964_v4 = vsel %vm739_vm0, %v956_v8, 0.0 }
 0x1e3   : > { %v889_v34 = vsub.f32 1.5, %v888_v29  ;;  %v965_v23 = vadd.f32 %v964_v4, %v963_v13 }
 0x1e4   : > { %v1321_v35 = vpop.eup %1320  ;;  %v1685_v53 = vadd.f32 1e-05, %v826_v32  ;;  %v943_v7 = vsel %vm927_vm11, %v919_v45, %v935_v60 }
 0x1e5   : > { %v890_v40 = vmul.f32 %v1319_v15, %v889_v34  ;;  %v896_v50 = vmul.f32 %v1321_v35, %v1655_v16  ;;  %vm902_vm9 = vweird.f32 %v1321_v35  ;;  %v952_v16 = vld [vmem:[%s1740_s3 + $0x28] sm:$0xff]  ;;  %v967_v27 = vadd.f32 %v966_v19, %v965_v23  ;;  %v954_v34 = vld [vmem:[%s1740_s3 + $0x38] sm:$0xff] }
 0x1e6   : > { %1322 = vrsqrt.f32 %v1685_v53  ;;  %vm903_vm12 = vmor %vm901_vm10, %vm902_vm9  ;;  %vm911_vm1 = vweird.f32 %v1685_v53 }
 0x1e7   : > { %v894_v43 = vsel %vm893_vm5, %v1319_v15, %v890_v40  ;;  %v897_v44 = vmul.f32 %v1321_v35, %v896_v50  ;;  %v969_v59 = vadd.f32 %v968_v26, %v967_v27 }
 0x1e8   : > { %v920_v3 = vmul.f32 %v894_v43, %v1600_v12 }
 0x1e9   : > { %v898_v49 = vmul.f32 0.5, %v897_v44 }
 0x1ea   : > { %v936_v0 = vmul.f32 0.2, %v920_v3  ;;  %vm928_vm13 = vcmp.gt.f32.partialorder %v920_v3, 0.0 }
 0x1eb   : > { %v899_v55 = vsub.f32 1.5, %v898_v49 }
 0x1ec   : > { %v1323_v56 = vpop.eup %1322  ;;  %v944_v15 = vsel %vm928_vm13, %v920_v3, %v936_v0 }
 0x1ed   : > { %v900_v62 = vmul.f32 %v1321_v35, %v899_v55  ;;  %v906_v12 = vmul.f32 %v1323_v56, %v1685_v53  ;;  %vm912_vm15 = vweird.f32 %v1323_v56  ;;  %v960_v25 = vmul.f32 %v952_v16, %v944_v15 }
 0x1ee   : > { %vm913_vm2 = vmor %vm911_vm1, %vm912_vm15 }
 0x1ef   : > { %v904_v2 = vsel %vm903_vm12, %v1321_v35, %v900_v62  ;;  %v907_v5 = vmul.f32 %v1323_v56, %v906_v12  ;;  %v972_v32 = vsel %vm739_vm0, %v960_v25, 0.0 }
 0x1f0   : > { %v921_v57 = vmul.f32 %v904_v2, %v1606_v17  ;;  %v959_v17 = vmul.f32 %v951_v9, %v943_v7 }
 0x1f1   : > { %v908_v10 = vmul.f32 0.5, %v907_v5 }
 0x1f2   : > { %vm929_vm14 = vcmp.gt.f32.partialorder %v921_v57, 0.0  ;;  %v937_v14 = vmul.f32 0.2, %v921_v57  ;;  %v970_v30 = vsel %vm739_vm0, %v959_v17, 0.0 }
 0x1f3   : > { %v909_v18 = vsub.f32 1.5, %v908_v10  ;;  %v971_v35 = vadd.f32 %v970_v30, %v969_v59 }
 0x1f4   : > { %v945_v20 = vsel %vm929_vm14, %v921_v57, %v937_v14 }
 0x1f5   : > { %v910_v24 = vmul.f32 %v1323_v56, %v909_v18  ;;  %v961_v29 = vmul.f32 %v953_v21, %v945_v20  ;;  %v973_v53 = vadd.f32 %v972_v32, %v971_v35 }
 0x1f7   : > { %v914_v28 = vsel %vm913_vm2, %v1323_v56, %v910_v24  ;;  %v974_v36 = vsel %vm739_vm0, %v961_v29, 0.0 }
 0x1f8   : > { %v922_v31 = vmul.f32 %v914_v28, %v1612_v22  ;;  %v975_v40 = vadd.f32 %v974_v36, %v973_v53 }
 0x1fa   : > { %vm930_vm3 = vcmp.gt.f32.partialorder %v922_v31, 0.0  ;;  %v938_v33 = vmul.f32 0.2, %v922_v31 }
 0x1fc   : > { %v946_v38 = vsel %vm930_vm3, %v922_v31, %v938_v33 }
 0x1fd   : > { %v962_v39 = vmul.f32 %v954_v34, %v946_v38 }
 0x1ff   : > { %v976_v50 = vsel %vm739_vm0, %v962_v39, 0.0 }
 0x200   : > { %v977_v22 = vadd.f32 %v976_v50, %v975_v40 }
 0x202   : > { %978 = vadd.xlane.f32.xlu2 %v977_v22 }
 0x275   : > { %v979_v41 = vpop.xlane.xlu2 %978 }
 0x276   : > { %v980_v42 = vrot.slane %v979_v41, 4 }
 0x278   : > { %v981_v43 = vadd.f32 %v980_v42, %v979_v41 }
 0x27a   : > { %v982_v44 = vrot.slane %v981_v43, 2 }
 0x27c   : > { %v983_v63 = vadd.f32 %v982_v44, %v981_v43 }
 0x27e   : > { %v984_v45 = vrot.slane %v983_v63, 1 }
 0x280   : > { %v985_v46 = vadd.f32 %v984_v45, %v983_v63 }
 0x282   : > { %1289 = vpush %v985_v46 }
 0x283   : > { %1291 = vpush %v987_v47 }
 0x2b3   : > { %s1290_s25 = spop %1289 }
 0x2b4   : > { %s1292_s26 = spop %1291 }
 0x2b5   : > { %s989_s30 = sadd.f32 %s1292_s26, %s1290_s25 }
 0x2b7   : > { %v990_v49 = vstv %s989_s30 }
 0x2b8   : > { %991 = vst [vmem:[%s222_s29] sm:$0x1] %v990_v49 }
 0x2b9 PF: > { %s17_s20 = sadd.s32 1, %s1330_s20  }
 0x2ba   : > { %p14_p4 = scmp.ge.s32.totalorder %s17_s20, 4  }
 0x2bc   :  { %16 = sbr.rel (!%p14_p4) target bundleno = 3 (0x3), region = 70 }

</bundles_post_ra>
